<compile_context>
chip_gen: v7x
topology: tpu7x:2x2x1
jax: 0.10.0
libtpu: 0.0.40
codegen_flags: <defaults>
</compile_context>

<pallas_src>
import functools

import jax
import jax.numpy as jnp
import numpy as np
from jax import lax
from jax.experimental import pallas as pl
from jax.experimental.pallas import tpu as pltpu


def _round_up(x, m):
    return ((x + m - 1) // m) * m


# ---------------------------------------------------------------------------
# Pallas kernel: one whole sample per grid step
# ---------------------------------------------------------------------------
def _upconv_kernel(x_ref, w_ref, b_ref, o_ref, *, sd, wp, l_out):
    # x_ref: (1, Dp, C_pad, L_in)     bf16  whole sample, end-padded slabs
    # w_ref: (8, Cout_pad, C_pad)     bf16  tap-major folded 2x2x2 weights
    # b_ref: (Cout_pad, 1)            f32
    # o_ref: (1, Sd, Cout_pad, L_out) f32
    w_taps = [w_ref[t] for t in range(8)]      # hoisted: loaded once per step
    b = b_ref[...]                             # (Cout_pad, 1)
    offs = (0, 1, wp, wp + 1)                  # lane offsets for (kh, kw)

    for d in range(sd):                        # static unroll over output depth
        x0 = x_ref[0, d]                       # (C_pad, L_in)  slab d
        x1 = x_ref[0, d + 1]                   # slab d + 1
        acc = b                                # broadcasts to (Cout_pad, l_out)
        t = 0
        for x in (x0, x1):                     # kd = 0, 1
            for off in offs:                   # (kh, kw) = (0,0),(0,1),(1,0),(1,1)
                acc = acc + jnp.dot(w_taps[t], x[:, off:off + l_out],
                                    preferred_element_type=jnp.float32)
                t += 1
        o_ref[0, d] = acc.astype(o_ref.dtype)


# ---------------------------------------------------------------------------
# Trilinear interpolation (matches torch F.interpolate, align_corners=False)
# ---------------------------------------------------------------------------
def _linear_resize_axis(x, axis, out_s):
    in_s = x.shape[axis]
    scale = in_s / out_s
    dst = jnp.arange(out_s, dtype=jnp.float32)
    src = (dst + 0.5) * scale - 0.5
    src = jnp.maximum(src, 0.0)
    i0 = jnp.minimum(jnp.floor(src).astype(jnp.int32), in_s - 1)
    i1 = jnp.minimum(i0 + 1, in_s - 1)
    w1 = src - i0.astype(jnp.float32)
    w0 = 1.0 - w1
    x0 = jnp.take(x, i0, axis=axis)
    x1 = jnp.take(x, i1, axis=axis)
    shp = [1] * x.ndim
    shp[axis] = out_s
    return x0 * w0.reshape(shp) + x1 * w1.reshape(shp)


def trilinear_interpolate(x_ncdhw, size):
    out = x_ncdhw
    for ax, s in zip((2, 3, 4), size):
        out = _linear_resize_axis(out, ax, s)
    return out


# ---------------------------------------------------------------------------
# Full module forward
# ---------------------------------------------------------------------------
def unet3d_upconv_forward(x_ncdhw, weight_oidhw, bias, *, size):
    """x: (N, C, D, H, W); weight: (Cout, Cin, 2, 2, 2); bias: (Cout,)."""
    N, C, D, H, W = x_ncdhw.shape
    Cout = weight_oidhw.shape[0]
    Sd, Sh, Sw = size

    # TODO(synk): trilinear interpolation stays as XLA glue (gather + lerp).
    # Transpose BEFORE upsampling (tensor is smallest here), then resize in
    # the kernel's depth-major layout -> no full-size transpose afterwards.
    xt = jnp.transpose(x_ncdhw, (0, 2, 1, 3, 4))           # (N, D, C, H, W)
    for ax, s in zip((1, 3, 4), size):
        xt = _linear_resize_axis(xt, ax, s)                # (N, Sd, C, Sh, Sw) f32

    Dp, Hp, Wp = Sd + 1, Sh + 1, Sw + 1
    L = Hp * Wp
    C_pad = _round_up(C, 16)                 # bf16 sublane packing
    Cout_pad = _round_up(Cout, 8)            # f32 output sublane tiling
    L_out = _round_up(L, 128)                # lane-dense output width
    L_in = _round_up(L_out + Wp + 1, 128)    # halo for the kh*Wp + kw lane shifts

    # end-pad D/H/W by one zero, pad channels, flatten the (H,W) plane on lanes
    xp = jnp.pad(xt, ((0, 0), (0, 1), (0, C_pad - C), (0, 1), (0, 1)))
    xp = xp.reshape(N, Dp, C_pad, L)
    xp = jnp.pad(xp, ((0, 0), (0, 0), (0, 0), (0, L_in - L))).astype(jnp.bfloat16)

    # fold the 2x2x2 taps onto the leading dim: w3[kd*4 + kh*2 + kw, co, ci]
    w_p = jnp.pad(weight_oidhw,
                  ((0, Cout_pad - Cout), (0, C_pad - C), (0, 0), (0, 0), (0, 0)))
    w3 = jnp.transpose(w_p, (2, 3, 4, 0, 1)).reshape(8, Cout_pad, C_pad)
    w3 = w3.astype(jnp.bfloat16)
    b2 = jnp.pad(bias, (0, Cout_pad - Cout)).reshape(Cout_pad, 1).astype(jnp.float32)

    kernel = functools.partial(_upconv_kernel, sd=Sd, wp=Wp, l_out=L_out)

    cost = pl.CostEstimate(
        flops=2 * N * Sd * 8 * Cout_pad * C_pad * L_out,
        transcendentals=0,
        bytes_accessed=(N * Dp * C_pad * L_in * 2          # bf16 input (read once)
                        + N * Sd * Cout_pad * L_out * 4    # f32 output
                        + 8 * Cout_pad * C_pad * 2
                        + Cout_pad * 4),
    )

    # TODO(synk): for very large D*H*W add depth-chunk (Td-slab + 1 halo) tiling
    #             so a block stays within v7x's 64 MiB VMEM; whole-sample blocks
    #             are fine at these sizes.
    out = pl.pallas_call(
        kernel,
        out_shape=jax.ShapeDtypeStruct((N, Sd, Cout_pad, L_out), jnp.float32),
        grid=(N,),
        in_specs=[
            pl.BlockSpec((1, Dp, C_pad, L_in), lambda n: (n, 0, 0, 0)),   # whole sample
            pl.BlockSpec((8, Cout_pad, C_pad), lambda n: (0, 0, 0)),      # folded weights
            pl.BlockSpec((Cout_pad, 1), lambda n: (0, 0)),                # bias
        ],
        out_specs=pl.BlockSpec((1, Sd, Cout_pad, L_out), lambda n: (n, 0, 0, 0)),
        compiler_params=pltpu.CompilerParams(dimension_semantics=("parallel",)),
        cost_estimate=cost,
    )(xp, w3, b2)

    # TODO(synk): the final crop+reshape+transpose of the (small) output stays
    #             as one fused XLA copy; emitting NCDHW from the kernel would
    #             need cross-sublane stores.
    out = out[:, :, :Cout, :L].reshape(N, Sd, Cout, Hp, Wp)[:, :, :, :Sh, :Sw]
    return jnp.transpose(out, (0, 2, 1, 3, 4))             # (N, Cout, Sd, Sh, Sw)


if __name__ == "__main__":
    key = jax.random.PRNGKey(0)
    k1, k2, k3 = jax.random.split(key, 3)

    filters = 4
    N, D, H, W = 2, 6, 6, 6
    size = (8, 10, 12)

    x = jax.random.normal(k1, (N, filters, D, H, W), dtype=jnp.float32)
    weight = 0.1 * jax.random.normal(k2, (filters, filters, 2, 2, 2), dtype=jnp.float32)
    bias = 0.1 * jax.random.normal(k3, (filters,), dtype=jnp.float32)

    fwd = jax.jit(unet3d_upconv_forward, static_argnames=("size",))
    out = fwd(x, weight, bias, size=size)
    out = jax.block_until_ready(out)
    assert out.shape == (N, filters) + size, out.shape

    # pure-JAX f32 reference: same interpolation, then full conv(padding=1) + crop
    xi = trilinear_interpolate(x, size)
    ref = lax.conv_general_dilated(
        xi, weight, window_strides=(1, 1, 1),
        padding=((1, 1), (1, 1), (1, 1)),
        dimension_numbers=("NCDHW", "OIDHW", "NCDHW"),
        precision=lax.Precision.HIGHEST)
    ref = ref + bias.reshape(1, filters, 1, 1, 1)
    ref = ref[:, :, 1:, 1:, 1:]

    # bf16 operands with f32 accumulation -> slightly relaxed tolerance
    np.testing.assert_allclose(np.asarray(out), np.asarray(ref), rtol=2e-2, atol=2e-2)
    print("KERNEL_OK")
</pallas_src>

<mosaic_0001>
module attributes {stable_mosaic.version = 11 : i64} {
  func.func @_upconv_kernel(%arg0: i32, %arg1: memref<1x9x16x384xbf16, #tpu.memory_space<vmem>>, %arg2: memref<8x8x16xbf16, #tpu.memory_space<vmem>>, %arg3: memref<8x1xf32, #tpu.memory_space<vmem>>, %arg4: memref<1x8x8x256xf32, #tpu.memory_space<vmem>>) attributes {dimension_semantics = [#tpu.dimension_semantics<parallel>], iteration_bounds = array<i64: 2>, scalar_prefetch = 0 : i64, scratch_operands = 0 : i64, tpu.core_type = #tpu.core_type<tc>, window_params = [{transform_indices = @transform_0, window_bounds = array<i64: 1, 9, 16, 384>}, {pipeline_mode = #tpu.pipeline_mode<synchronous>, transform_indices = @transform_1, window_bounds = array<i64: 8, 8, 16>}, {pipeline_mode = #tpu.pipeline_mode<synchronous>, transform_indices = @transform_2, window_bounds = array<i64: 8, 1>}, {transform_indices = @transform_3, window_bounds = array<i64: 1, 8, 8, 256>}]} {
    %c0 = arith.constant 0 : index
    %c0_0 = arith.constant 0 : index
    %c0_1 = arith.constant 0 : index
    %0 = vector.load %arg2[%c0, %c0_0, %c0_1] : memref<8x8x16xbf16, #tpu.memory_space<vmem>>, vector<1x8x16xbf16>
    %1 = vector.shape_cast %0 : vector<1x8x16xbf16> to vector<8x16xbf16>
    %c1 = arith.constant 1 : index
    %c0_2 = arith.constant 0 : index
    %c0_3 = arith.constant 0 : index
    %2 = vector.load %arg2[%c1, %c0_2, %c0_3] : memref<8x8x16xbf16, #tpu.memory_space<vmem>>, vector<1x8x16xbf16>
    %3 = vector.shape_cast %2 : vector<1x8x16xbf16> to vector<8x16xbf16>
    %c2 = arith.constant 2 : index
    %c0_4 = arith.constant 0 : index
    %c0_5 = arith.constant 0 : index
    %4 = vector.load %arg2[%c2, %c0_4, %c0_5] : memref<8x8x16xbf16, #tpu.memory_space<vmem>>, vector<1x8x16xbf16>
    %5 = vector.shape_cast %4 : vector<1x8x16xbf16> to vector<8x16xbf16>
    %c3 = arith.constant 3 : index
    %c0_6 = arith.constant 0 : index
    %c0_7 = arith.constant 0 : index
    %6 = vector.load %arg2[%c3, %c0_6, %c0_7] : memref<8x8x16xbf16, #tpu.memory_space<vmem>>, vector<1x8x16xbf16>
    %7 = vector.shape_cast %6 : vector<1x8x16xbf16> to vector<8x16xbf16>
    %c4 = arith.constant 4 : index
    %c0_8 = arith.constant 0 : index
    %c0_9 = arith.constant 0 : index
    %8 = vector.load %arg2[%c4, %c0_8, %c0_9] : memref<8x8x16xbf16, #tpu.memory_space<vmem>>, vector<1x8x16xbf16>
    %9 = vector.shape_cast %8 : vector<1x8x16xbf16> to vector<8x16xbf16>
    %c5 = arith.constant 5 : index
    %c0_10 = arith.constant 0 : index
    %c0_11 = arith.constant 0 : index
    %10 = vector.load %arg2[%c5, %c0_10, %c0_11] : memref<8x8x16xbf16, #tpu.memory_space<vmem>>, vector<1x8x16xbf16>
    %11 = vector.shape_cast %10 : vector<1x8x16xbf16> to vector<8x16xbf16>
    %c6 = arith.constant 6 : index
    %c0_12 = arith.constant 0 : index
    %c0_13 = arith.constant 0 : index
    %12 = vector.load %arg2[%c6, %c0_12, %c0_13] : memref<8x8x16xbf16, #tpu.memory_space<vmem>>, vector<1x8x16xbf16>
    %13 = vector.shape_cast %12 : vector<1x8x16xbf16> to vector<8x16xbf16>
    %c7 = arith.constant 7 : index
    %c0_14 = arith.constant 0 : index
    %c0_15 = arith.constant 0 : index
    %14 = vector.load %arg2[%c7, %c0_14, %c0_15] : memref<8x8x16xbf16, #tpu.memory_space<vmem>>, vector<1x8x16xbf16>
    %15 = vector.shape_cast %14 : vector<1x8x16xbf16> to vector<8x16xbf16>
    %c0_16 = arith.constant 0 : index
    %c0_17 = arith.constant 0 : index
    %16 = vector.load %arg3[%c0_16, %c0_17] : memref<8x1xf32, #tpu.memory_space<vmem>>, vector<8x1xf32>
    %c0_18 = arith.constant 0 : index
    %c0_19 = arith.constant 0 : index
    %c0_20 = arith.constant 0 : index
    %c0_21 = arith.constant 0 : index
    %17 = vector.load %arg1[%c0_18, %c0_19, %c0_20, %c0_21] : memref<1x9x16x384xbf16, #tpu.memory_space<vmem>>, vector<1x1x16x384xbf16>
    %18 = vector.shape_cast %17 : vector<1x1x16x384xbf16> to vector<16x384xbf16>
    %c0_22 = arith.constant 0 : index
    %c1_23 = arith.constant 1 : index
    %c0_24 = arith.constant 0 : index
    %c0_25 = arith.constant 0 : index
    %19 = vector.load %arg1[%c0_22, %c1_23, %c0_24, %c0_25] : memref<1x9x16x384xbf16, #tpu.memory_space<vmem>>, vector<1x1x16x384xbf16>
    %20 = vector.shape_cast %19 : vector<1x1x16x384xbf16> to vector<16x384xbf16>
    %21 = vector.extract_strided_slice %18 {offsets = [0, 0], sizes = [16, 256], strides = [1, 1]} : vector<16x384xbf16> to vector<16x256xbf16>
    %cst = arith.constant dense<0.000000e+00> : vector<8x256xf32>
    %22 = tpu.matmul %1, %21, %cst {dimension_numbers = #tpu.dot_dimension_numbers<[1], [0], [0], [1], [0, 0, 1, 1], [], []>} : vector<8x16xbf16>, vector<16x256xbf16>, vector<8x256xf32> -> vector<8x256xf32>
    %23 = vector.broadcast %16 : vector<8x1xf32> to vector<8x256xf32>
    %24 = arith.addf %23, %22 : vector<8x256xf32>
    %25 = vector.extract_strided_slice %18 {offsets = [0, 1], sizes = [16, 256], strides = [1, 1]} : vector<16x384xbf16> to vector<16x256xbf16>
    %cst_26 = arith.constant dense<0.000000e+00> : vector<8x256xf32>
    %26 = tpu.matmul %3, %25, %cst_26 {dimension_numbers = #tpu.dot_dimension_numbers<[1], [0], [0], [1], [0, 0, 1, 1], [], []>} : vector<8x16xbf16>, vector<16x256xbf16>, vector<8x256xf32> -> vector<8x256xf32>
    %27 = arith.addf %24, %26 : vector<8x256xf32>
    %28 = vector.extract_strided_slice %18 {offsets = [0, 13], sizes = [16, 256], strides = [1, 1]} : vector<16x384xbf16> to vector<16x256xbf16>
    %cst_27 = arith.constant dense<0.000000e+00> : vector<8x256xf32>
    %29 = tpu.matmul %5, %28, %cst_27 {dimension_numbers = #tpu.dot_dimension_numbers<[1], [0], [0], [1], [0, 0, 1, 1], [], []>} : vector<8x16xbf16>, vector<16x256xbf16>, vector<8x256xf32> -> vector<8x256xf32>
    %30 = arith.addf %27, %29 : vector<8x256xf32>
    %31 = vector.extract_strided_slice %18 {offsets = [0, 14], sizes = [16, 256], strides = [1, 1]} : vector<16x384xbf16> to vector<16x256xbf16>
    %cst_28 = arith.constant dense<0.000000e+00> : vector<8x256xf32>
    %32 = tpu.matmul %7, %31, %cst_28 {dimension_numbers = #tpu.dot_dimension_numbers<[1], [0], [0], [1], [0, 0, 1, 1], [], []>} : vector<8x16xbf16>, vector<16x256xbf16>, vector<8x256xf32> -> vector<8x256xf32>
    %33 = arith.addf %30, %32 : vector<8x256xf32>
    %34 = vector.extract_strided_slice %20 {offsets = [0, 0], sizes = [16, 256], strides = [1, 1]} : vector<16x384xbf16> to vector<16x256xbf16>
    %cst_29 = arith.constant dense<0.000000e+00> : vector<8x256xf32>
    %35 = tpu.matmul %9, %34, %cst_29 {dimension_numbers = #tpu.dot_dimension_numbers<[1], [0], [0], [1], [0, 0, 1, 1], [], []>} : vector<8x16xbf16>, vector<16x256xbf16>, vector<8x256xf32> -> vector<8x256xf32>
    %36 = arith.addf %33, %35 : vector<8x256xf32>
    %37 = vector.extract_strided_slice %20 {offsets = [0, 1], sizes = [16, 256], strides = [1, 1]} : vector<16x384xbf16> to vector<16x256xbf16>
    %cst_30 = arith.constant dense<0.000000e+00> : vector<8x256xf32>
    %38 = tpu.matmul %11, %37, %cst_30 {dimension_numbers = #tpu.dot_dimension_numbers<[1], [0], [0], [1], [0, 0, 1, 1], [], []>} : vector<8x16xbf16>, vector<16x256xbf16>, vector<8x256xf32> -> vector<8x256xf32>
    %39 = arith.addf %36, %38 : vector<8x256xf32>
    %40 = vector.extract_strided_slice %20 {offsets = [0, 13], sizes = [16, 256], strides = [1, 1]} : vector<16x384xbf16> to vector<16x256xbf16>
    %cst_31 = arith.constant dense<0.000000e+00> : vector<8x256xf32>
    %41 = tpu.matmul %13, %40, %cst_31 {dimension_numbers = #tpu.dot_dimension_numbers<[1], [0], [0], [1], [0, 0, 1, 1], [], []>} : vector<8x16xbf16>, vector<16x256xbf16>, vector<8x256xf32> -> vector<8x256xf32>
    %42 = arith.addf %39, %41 : vector<8x256xf32>
    %43 = vector.extract_strided_slice %20 {offsets = [0, 14], sizes = [16, 256], strides = [1, 1]} : vector<16x384xbf16> to vector<16x256xbf16>
    %cst_32 = arith.constant dense<0.000000e+00> : vector<8x256xf32>
    %44 = tpu.matmul %15, %43, %cst_32 {dimension_numbers = #tpu.dot_dimension_numbers<[1], [0], [0], [1], [0, 0, 1, 1], [], []>} : vector<8x16xbf16>, vector<16x256xbf16>, vector<8x256xf32> -> vector<8x256xf32>
    %45 = arith.addf %42, %44 : vector<8x256xf32>
    %c0_33 = arith.constant 0 : index
    %c0_34 = arith.constant 0 : index
    %c0_35 = arith.constant 0 : index
    %c0_36 = arith.constant 0 : index
    %46 = vector.load %arg4[%c0_33, %c0_34, %c0_35, %c0_36] : memref<1x8x8x256xf32, #tpu.memory_space<vmem>>, vector<1x1x8x256xf32>
    %47 = vector.shape_cast %46 : vector<1x1x8x256xf32> to vector<8x256xf32>
    %48 = vector.shape_cast %45 : vector<8x256xf32> to vector<1x1x8x256xf32>
    tpu.vector_store %arg4[%c0_33, %c0_34, %c0_35, %c0_36], %48 {strides = array<i32>} : memref<1x8x8x256xf32, #tpu.memory_space<vmem>>, vector<1x1x8x256xf32>,
    %c0_37 = arith.constant 0 : index
    %c1_38 = arith.constant 1 : index
    %c0_39 = arith.constant 0 : index
    %c0_40 = arith.constant 0 : index
    %49 = vector.load %arg1[%c0_37, %c1_38, %c0_39, %c0_40] : memref<1x9x16x384xbf16, #tpu.memory_space<vmem>>, vector<1x1x16x384xbf16>
    %50 = vector.shape_cast %49 : vector<1x1x16x384xbf16> to vector<16x384xbf16>
    %c0_41 = arith.constant 0 : index
    %c2_42 = arith.constant 2 : index
    %c0_43 = arith.constant 0 : index
    %c0_44 = arith.constant 0 : index
    %51 = vector.load %arg1[%c0_41, %c2_42, %c0_43, %c0_44] : memref<1x9x16x384xbf16, #tpu.memory_space<vmem>>, vector<1x1x16x384xbf16>
    %52 = vector.shape_cast %51 : vector<1x1x16x384xbf16> to vector<16x384xbf16>
    %53 = vector.extract_strided_slice %50 {offsets = [0, 0], sizes = [16, 256], strides = [1, 1]} : vector<16x384xbf16> to vector<16x256xbf16>
    %cst_45 = arith.constant dense<0.000000e+00> : vector<8x256xf32>
    %54 = tpu.matmul %1, %53, %cst_45 {dimension_numbers = #tpu.dot_dimension_numbers<[1], [0], [0], [1], [0, 0, 1, 1], [], []>} : vector<8x16xbf16>, vector<16x256xbf16>, vector<8x256xf32> -> vector<8x256xf32>
    %55 = vector.broadcast %16 : vector<8x1xf32> to vector<8x256xf32>
    %56 = arith.addf %55, %54 : vector<8x256xf32>
    %57 = vector.extract_strided_slice %50 {offsets = [0, 1], sizes = [16, 256], strides = [1, 1]} : vector<16x384xbf16> to vector<16x256xbf16>
    %cst_46 = arith.constant dense<0.000000e+00> : vector<8x256xf32>
    %58 = tpu.matmul %3, %57, %cst_46 {dimension_numbers = #tpu.dot_dimension_numbers<[1], [0], [0], [1], [0, 0, 1, 1], [], []>} : vector<8x16xbf16>, vector<16x256xbf16>, vector<8x256xf32> -> vector<8x256xf32>
    %59 = arith.addf %56, %58 : vector<8x256xf32>
    %60 = vector.extract_strided_slice %50 {offsets = [0, 13], sizes = [16, 256], strides = [1, 1]} : vector<16x384xbf16> to vector<16x256xbf16>
    %cst_47 = arith.constant dense<0.000000e+00> : vector<8x256xf32>
    %61 = tpu.matmul %5, %60, %cst_47 {dimension_numbers = #tpu.dot_dimension_numbers<[1], [0], [0], [1], [0, 0, 1, 1], [], []>} : vector<8x16xbf16>, vector<16x256xbf16>, vector<8x256xf32> -> vector<8x256xf32>
    %62 = arith.addf %59, %61 : vector<8x256xf32>
    %63 = vector.extract_strided_slice %50 {offsets = [0, 14], sizes = [16, 256], strides = [1, 1]} : vector<16x384xbf16> to vector<16x256xbf16>
    %cst_48 = arith.constant dense<0.000000e+00> : vector<8x256xf32>
    %64 = tpu.matmul %7, %63, %cst_48 {dimension_numbers = #tpu.dot_dimension_numbers<[1], [0], [0], [1], [0, 0, 1, 1], [], []>} : vector<8x16xbf16>, vector<16x256xbf16>, vector<8x256xf32> -> vector<8x256xf32>
    %65 = arith.addf %62, %64 : vector<8x256xf32>
    %66 = vector.extract_strided_slice %52 {offsets = [0, 0], sizes = [16, 256], strides = [1, 1]} : vector<16x384xbf16> to vector<16x256xbf16>
    %cst_49 = arith.constant dense<0.000000e+00> : vector<8x256xf32>
    %67 = tpu.matmul %9, %66, %cst_49 {dimension_numbers = #tpu.dot_dimension_numbers<[1], [0], [0], [1], [0, 0, 1, 1], [], []>} : vector<8x16xbf16>, vector<16x256xbf16>, vector<8x256xf32> -> vector<8x256xf32>
    %68 = arith.addf %65, %67 : vector<8x256xf32>
    %69 = vector.extract_strided_slice %52 {offsets = [0, 1], sizes = [16, 256], strides = [1, 1]} : vector<16x384xbf16> to vector<16x256xbf16>
    %cst_50 = arith.constant dense<0.000000e+00> : vector<8x256xf32>
    %70 = tpu.matmul %11, %69, %cst_50 {dimension_numbers = #tpu.dot_dimension_numbers<[1], [0], [0], [1], [0, 0, 1, 1], [], []>} : vector<8x16xbf16>, vector<16x256xbf16>, vector<8x256xf32> -> vector<8x256xf32>
    %71 = arith.addf %68, %70 : vector<8x256xf32>
    %72 = vector.extract_strided_slice %52 {offsets = [0, 13], sizes = [16, 256], strides = [1, 1]} : vector<16x384xbf16> to vector<16x256xbf16>
    %cst_51 = arith.constant dense<0.000000e+00> : vector<8x256xf32>
    %73 = tpu.matmul %13, %72, %cst_51 {dimension_numbers = #tpu.dot_dimension_numbers<[1], [0], [0], [1], [0, 0, 1, 1], [], []>} : vector<8x16xbf16>, vector<16x256xbf16>, vector<8x256xf32> -> vector<8x256xf32>
    %74 = arith.addf %71, %73 : vector<8x256xf32>
    %75 = vector.extract_strided_slice %52 {offsets = [0, 14], sizes = [16, 256], strides = [1, 1]} : vector<16x384xbf16> to vector<16x256xbf16>
    %cst_52 = arith.constant dense<0.000000e+00> : vector<8x256xf32>
    %76 = tpu.matmul %15, %75, %cst_52 {dimension_numbers = #tpu.dot_dimension_numbers<[1], [0], [0], [1], [0, 0, 1, 1], [], []>} : vector<8x16xbf16>, vector<16x256xbf16>, vector<8x256xf32> -> vector<8x256xf32>
    %77 = arith.addf %74, %76 : vector<8x256xf32>
    %c0_53 = arith.constant 0 : index
    %c1_54 = arith.constant 1 : index
    %c0_55 = arith.constant 0 : index
    %c0_56 = arith.constant 0 : index
    %78 = vector.load %arg4[%c0_53, %c1_54, %c0_55, %c0_56] : memref<1x8x8x256xf32, #tpu.memory_space<vmem>>, vector<1x1x8x256xf32>
    %79 = vector.shape_cast %78 : vector<1x1x8x256xf32> to vector<8x256xf32>
    %80 = vector.shape_cast %77 : vector<8x256xf32> to vector<1x1x8x256xf32>
    tpu.vector_store %arg4[%c0_53, %c1_54, %c0_55, %c0_56], %80 {strides = array<i32>} : memref<1x8x8x256xf32, #tpu.memory_space<vmem>>, vector<1x1x8x256xf32>,
    %c0_57 = arith.constant 0 : index
    %c2_58 = arith.constant 2 : index
    %c0_59 = arith.constant 0 : index
    %c0_60 = arith.constant 0 : index
    %81 = vector.load %arg1[%c0_57, %c2_58, %c0_59, %c0_60] : memref<1x9x16x384xbf16, #tpu.memory_space<vmem>>, vector<1x1x16x384xbf16>
    %82 = vector.shape_cast %81 : vector<1x1x16x384xbf16> to vector<16x384xbf16>
    %c0_61 = arith.constant 0 : index
    %c3_62 = arith.constant 3 : index
    %c0_63 = arith.constant 0 : index
    %c0_64 = arith.constant 0 : index
    %83 = vector.load %arg1[%c0_61, %c3_62, %c0_63, %c0_64] : memref<1x9x16x384xbf16, #tpu.memory_space<vmem>>, vector<1x1x16x384xbf16>
    %84 = vector.shape_cast %83 : vector<1x1x16x384xbf16> to vector<16x384xbf16>
    %85 = vector.extract_strided_slice %82 {offsets = [0, 0], sizes = [16, 256], strides = [1, 1]} : vector<16x384xbf16> to vector<16x256xbf16>
    %cst_65 = arith.constant dense<0.000000e+00> : vector<8x256xf32>
    %86 = tpu.matmul %1, %85, %cst_65 {dimension_numbers = #tpu.dot_dimension_numbers<[1], [0], [0], [1], [0, 0, 1, 1], [], []>} : vector<8x16xbf16>, vector<16x256xbf16>, vector<8x256xf32> -> vector<8x256xf32>
    %87 = vector.broadcast %16 : vector<8x1xf32> to vector<8x256xf32>
    %88 = arith.addf %87, %86 : vector<8x256xf32>
    %89 = vector.extract_strided_slice %82 {offsets = [0, 1], sizes = [16, 256], strides = [1, 1]} : vector<16x384xbf16> to vector<16x256xbf16>
    %cst_66 = arith.constant dense<0.000000e+00> : vector<8x256xf32>
    %90 = tpu.matmul %3, %89, %cst_66 {dimension_numbers = #tpu.dot_dimension_numbers<[1], [0], [0], [1], [0, 0, 1, 1], [], []>} : vector<8x16xbf16>, vector<16x256xbf16>, vector<8x256xf32> -> vector<8x256xf32>
    %91 = arith.addf %88, %90 : vector<8x256xf32>
    %92 = vector.extract_strided_slice %82 {offsets = [0, 13], sizes = [16, 256], strides = [1, 1]} : vector<16x384xbf16> to vector<16x256xbf16>
    %cst_67 = arith.constant dense<0.000000e+00> : vector<8x256xf32>
    %93 = tpu.matmul %5, %92, %cst_67 {dimension_numbers = #tpu.dot_dimension_numbers<[1], [0], [0], [1], [0, 0, 1, 1], [], []>} : vector<8x16xbf16>, vector<16x256xbf16>, vector<8x256xf32> -> vector<8x256xf32>
    %94 = arith.addf %91, %93 : vector<8x256xf32>
    %95 = vector.extract_strided_slice %82 {offsets = [0, 14], sizes = [16, 256], strides = [1, 1]} : vector<16x384xbf16> to vector<16x256xbf16>
    %cst_68 = arith.constant dense<0.000000e+00> : vector<8x256xf32>
    %96 = tpu.matmul %7, %95, %cst_68 {dimension_numbers = #tpu.dot_dimension_numbers<[1], [0], [0], [1], [0, 0, 1, 1], [], []>} : vector<8x16xbf16>, vector<16x256xbf16>, vector<8x256xf32> -> vector<8x256xf32>
    %97 = arith.addf %94, %96 : vector<8x256xf32>
    %98 = vector.extract_strided_slice %84 {offsets = [0, 0], sizes = [16, 256], strides = [1, 1]} : vector<16x384xbf16> to vector<16x256xbf16>
    %cst_69 = arith.constant dense<0.000000e+00> : vector<8x256xf32>
    %99 = tpu.matmul %9, %98, %cst_69 {dimension_numbers = #tpu.dot_dimension_numbers<[1], [0], [0], [1], [0, 0, 1, 1], [], []>} : vector<8x16xbf16>, vector<16x256xbf16>, vector<8x256xf32> -> vector<8x256xf32>
    %100 = arith.addf %97, %99 : vector<8x256xf32>
    %101 = vector.extract_strided_slice %84 {offsets = [0, 1], sizes = [16, 256], strides = [1, 1]} : vector<16x384xbf16> to vector<16x256xbf16>
    %cst_70 = arith.constant dense<0.000000e+00> : vector<8x256xf32>
    %102 = tpu.matmul %11, %101, %cst_70 {dimension_numbers = #tpu.dot_dimension_numbers<[1], [0], [0], [1], [0, 0, 1, 1], [], []>} : vector<8x16xbf16>, vector<16x256xbf16>, vector<8x256xf32> -> vector<8x256xf32>
    %103 = arith.addf %100, %102 : vector<8x256xf32>
    %104 = vector.extract_strided_slice %84 {offsets = [0, 13], sizes = [16, 256], strides = [1, 1]} : vector<16x384xbf16> to vector<16x256xbf16>
    %cst_71 = arith.constant dense<0.000000e+00> : vector<8x256xf32>
    %105 = tpu.matmul %13, %104, %cst_71 {dimension_numbers = #tpu.dot_dimension_numbers<[1], [0], [0], [1], [0, 0, 1, 1], [], []>} : vector<8x16xbf16>, vector<16x256xbf16>, vector<8x256xf32> -> vector<8x256xf32>
    %106 = arith.addf %103, %105 : vector<8x256xf32>
    %107 = vector.extract_strided_slice %84 {offsets = [0, 14], sizes = [16, 256], strides = [1, 1]} : vector<16x384xbf16> to vector<16x256xbf16>
    %cst_72 = arith.constant dense<0.000000e+00> : vector<8x256xf32>
    %108 = tpu.matmul %15, %107, %cst_72 {dimension_numbers = #tpu.dot_dimension_numbers<[1], [0], [0], [1], [0, 0, 1, 1], [], []>} : vector<8x16xbf16>, vector<16x256xbf16>, vector<8x256xf32> -> vector<8x256xf32>
    %109 = arith.addf %106, %108 : vector<8x256xf32>
    %c0_73 = arith.constant 0 : index
    %c2_74 = arith.constant 2 : index
    %c0_75 = arith.constant 0 : index
    %c0_76 = arith.constant 0 : index
    %110 = vector.load %arg4[%c0_73, %c2_74, %c0_75, %c0_76] : memref<1x8x8x256xf32, #tpu.memory_space<vmem>>, vector<1x1x8x256xf32>
    %111 = vector.shape_cast %110 : vector<1x1x8x256xf32> to vector<8x256xf32>
    %112 = vector.shape_cast %109 : vector<8x256xf32> to vector<1x1x8x256xf32>
    tpu.vector_store %arg4[%c0_73, %c2_74, %c0_75, %c0_76], %112 {strides = array<i32>} : memref<1x8x8x256xf32, #tpu.memory_space<vmem>>, vector<1x1x8x256xf32>,
    %c0_77 = arith.constant 0 : index
    %c3_78 = arith.constant 3 : index
    %c0_79 = arith.constant 0 : index
    %c0_80 = arith.constant 0 : index
    %113 = vector.load %arg1[%c0_77, %c3_78, %c0_79, %c0_80] : memref<1x9x16x384xbf16, #tpu.memory_space<vmem>>, vector<1x1x16x384xbf16>
    %114 = vector.shape_cast %113 : vector<1x1x16x384xbf16> to vector<16x384xbf16>
    %c0_81 = arith.constant 0 : index
    %c4_82 = arith.constant 4 : index
    %c0_83 = arith.constant 0 : index
    %c0_84 = arith.constant 0 : index
    %115 = vector.load %arg1[%c0_81, %c4_82, %c0_83, %c0_84] : memref<1x9x16x384xbf16, #tpu.memory_space<vmem>>, vector<1x1x16x384xbf16>
    %116 = vector.shape_cast %115 : vector<1x1x16x384xbf16> to vector<16x384xbf16>
    %117 = vector.extract_strided_slice %114 {offsets = [0, 0], sizes = [16, 256], strides = [1, 1]} : vector<16x384xbf16> to vector<16x256xbf16>
    %cst_85 = arith.constant dense<0.000000e+00> : vector<8x256xf32>
    %118 = tpu.matmul %1, %117, %cst_85 {dimension_numbers = #tpu.dot_dimension_numbers<[1], [0], [0], [1], [0, 0, 1, 1], [], []>} : vector<8x16xbf16>, vector<16x256xbf16>, vector<8x256xf32> -> vector<8x256xf32>
    %119 = vector.broadcast %16 : vector<8x1xf32> to vector<8x256xf32>
    %120 = arith.addf %119, %118 : vector<8x256xf32>
    %121 = vector.extract_strided_slice %114 {offsets = [0, 1], sizes = [16, 256], strides = [1, 1]} : vector<16x384xbf16> to vector<16x256xbf16>
    %cst_86 = arith.constant dense<0.000000e+00> : vector<8x256xf32>
    %122 = tpu.matmul %3, %121, %cst_86 {dimension_numbers = #tpu.dot_dimension_numbers<[1], [0], [0], [1], [0, 0, 1, 1], [], []>} : vector<8x16xbf16>, vector<16x256xbf16>, vector<8x256xf32> -> vector<8x256xf32>
    %123 = arith.addf %120, %122 : vector<8x256xf32>
    %124 = vector.extract_strided_slice %114 {offsets = [0, 13], sizes = [16, 256], strides = [1, 1]} : vector<16x384xbf16> to vector<16x256xbf16>
    %cst_87 = arith.constant dense<0.000000e+00> : vector<8x256xf32>
    %125 = tpu.matmul %5, %124, %cst_87 {dimension_numbers = #tpu.dot_dimension_numbers<[1], [0], [0], [1], [0, 0, 1, 1], [], []>} : vector<8x16xbf16>, vector<16x256xbf16>, vector<8x256xf32> -> vector<8x256xf32>
    %126 = arith.addf %123, %125 : vector<8x256xf32>
    %127 = vector.extract_strided_slice %114 {offsets = [0, 14], sizes = [16, 256], strides = [1, 1]} : vector<16x384xbf16> to vector<16x256xbf16>
    %cst_88 = arith.constant dense<0.000000e+00> : vector<8x256xf32>
    %128 = tpu.matmul %7, %127, %cst_88 {dimension_numbers = #tpu.dot_dimension_numbers<[1], [0], [0], [1], [0, 0, 1, 1], [], []>} : vector<8x16xbf16>, vector<16x256xbf16>, vector<8x256xf32> -> vector<8x256xf32>
    %129 = arith.addf %126, %128 : vector<8x256xf32>
    %130 = vector.extract_strided_slice %116 {offsets = [0, 0], sizes = [16, 256], strides = [1, 1]} : vector<16x384xbf16> to vector<16x256xbf16>
    %cst_89 = arith.constant dense<0.000000e+00> : vector<8x256xf32>
    %131 = tpu.matmul %9, %130, %cst_89 {dimension_numbers = #tpu.dot_dimension_numbers<[1], [0], [0], [1], [0, 0, 1, 1], [], []>} : vector<8x16xbf16>, vector<16x256xbf16>, vector<8x256xf32> -> vector<8x256xf32>
    %132 = arith.addf %129, %131 : vector<8x256xf32>
    %133 = vector.extract_strided_slice %116 {offsets = [0, 1], sizes = [16, 256], strides = [1, 1]} : vector<16x384xbf16> to vector<16x256xbf16>
    %cst_90 = arith.constant dense<0.000000e+00> : vector<8x256xf32>
    %134 = tpu.matmul %11, %133, %cst_90 {dimension_numbers = #tpu.dot_dimension_numbers<[1], [0], [0], [1], [0, 0, 1, 1], [], []>} : vector<8x16xbf16>, vector<16x256xbf16>, vector<8x256xf32> -> vector<8x256xf32>
    %135 = arith.addf %132, %134 : vector<8x256xf32>
    %136 = vector.extract_strided_slice %116 {offsets = [0, 13], sizes = [16, 256], strides = [1, 1]} : vector<16x384xbf16> to vector<16x256xbf16>
    %cst_91 = arith.constant dense<0.000000e+00> : vector<8x256xf32>
    %137 = tpu.matmul %13, %136, %cst_91 {dimension_numbers = #tpu.dot_dimension_numbers<[1], [0], [0], [1], [0, 0, 1, 1], [], []>} : vector<8x16xbf16>, vector<16x256xbf16>, vector<8x256xf32> -> vector<8x256xf32>
    %138 = arith.addf %135, %137 : vector<8x256xf32>
    %139 = vector.extract_strided_slice %116 {offsets = [0, 14], sizes = [16, 256], strides = [1, 1]} : vector<16x384xbf16> to vector<16x256xbf16>
    %cst_92 = arith.constant dense<0.000000e+00> : vector<8x256xf32>
    %140 = tpu.matmul %15, %139, %cst_92 {dimension_numbers = #tpu.dot_dimension_numbers<[1], [0], [0], [1], [0, 0, 1, 1], [], []>} : vector<8x16xbf16>, vector<16x256xbf16>, vector<8x256xf32> -> vector<8x256xf32>
    %141 = arith.addf %138, %140 : vector<8x256xf32>
    %c0_93 = arith.constant 0 : index
    %c3_94 = arith.constant 3 : index
    %c0_95 = arith.constant 0 : index
    %c0_96 = arith.constant 0 : index
    %142 = vector.load %arg4[%c0_93, %c3_94, %c0_95, %c0_96] : memref<1x8x8x256xf32, #tpu.memory_space<vmem>>, vector<1x1x8x256xf32>
    %143 = vector.shape_cast %142 : vector<1x1x8x256xf32> to vector<8x256xf32>
    %144 = vector.shape_cast %141 : vector<8x256xf32> to vector<1x1x8x256xf32>
    tpu.vector_store %arg4[%c0_93, %c3_94, %c0_95, %c0_96], %144 {strides = array<i32>} : memref<1x8x8x256xf32, #tpu.memory_space<vmem>>, vector<1x1x8x256xf32>,
    %c0_97 = arith.constant 0 : index
    %c4_98 = arith.constant 4 : index
    %c0_99 = arith.constant 0 : index
    %c0_100 = arith.constant 0 : index
    %145 = vector.load %arg1[%c0_97, %c4_98, %c0_99, %c0_100] : memref<1x9x16x384xbf16, #tpu.memory_space<vmem>>, vector<1x1x16x384xbf16>
    %146 = vector.shape_cast %145 : vector<1x1x16x384xbf16> to vector<16x384xbf16>
    %c0_101 = arith.constant 0 : index
    %c5_102 = arith.constant 5 : index
    %c0_103 = arith.constant 0 : index
    %c0_104 = arith.constant 0 : index
    %147 = vector.load %arg1[%c0_101, %c5_102, %c0_103, %c0_104] : memref<1x9x16x384xbf16, #tpu.memory_space<vmem>>, vector<1x1x16x384xbf16>
    %148 = vector.shape_cast %147 : vector<1x1x16x384xbf16> to vector<16x384xbf16>
    %149 = vector.extract_strided_slice %146 {offsets = [0, 0], sizes = [16, 256], strides = [1, 1]} : vector<16x384xbf16> to vector<16x256xbf16>
    %cst_105 = arith.constant dense<0.000000e+00> : vector<8x256xf32>
    %150 = tpu.matmul %1, %149, %cst_105 {dimension_numbers = #tpu.dot_dimension_numbers<[1], [0], [0], [1], [0, 0, 1, 1], [], []>} : vector<8x16xbf16>, vector<16x256xbf16>, vector<8x256xf32> -> vector<8x256xf32>
    %151 = vector.broadcast %16 : vector<8x1xf32> to vector<8x256xf32>
    %152 = arith.addf %151, %150 : vector<8x256xf32>
    %153 = vector.extract_strided_slice %146 {offsets = [0, 1], sizes = [16, 256], strides = [1, 1]} : vector<16x384xbf16> to vector<16x256xbf16>
    %cst_106 = arith.constant dense<0.000000e+00> : vector<8x256xf32>
    %154 = tpu.matmul %3, %153, %cst_106 {dimension_numbers = #tpu.dot_dimension_numbers<[1], [0], [0], [1], [0, 0, 1, 1], [], []>} : vector<8x16xbf16>, vector<16x256xbf16>, vector<8x256xf32> -> vector<8x256xf32>
    %155 = arith.addf %152, %154 : vector<8x256xf32>
    %156 = vector.extract_strided_slice %146 {offsets = [0, 13], sizes = [16, 256], strides = [1, 1]} : vector<16x384xbf16> to vector<16x256xbf16>
    %cst_107 = arith.constant dense<0.000000e+00> : vector<8x256xf32>
    %157 = tpu.matmul %5, %156, %cst_107 {dimension_numbers = #tpu.dot_dimension_numbers<[1], [0], [0], [1], [0, 0, 1, 1], [], []>} : vector<8x16xbf16>, vector<16x256xbf16>, vector<8x256xf32> -> vector<8x256xf32>
    %158 = arith.addf %155, %157 : vector<8x256xf32>
    %159 = vector.extract_strided_slice %146 {offsets = [0, 14], sizes = [16, 256], strides = [1, 1]} : vector<16x384xbf16> to vector<16x256xbf16>
    %cst_108 = arith.constant dense<0.000000e+00> : vector<8x256xf32>
    %160 = tpu.matmul %7, %159, %cst_108 {dimension_numbers = #tpu.dot_dimension_numbers<[1], [0], [0], [1], [0, 0, 1, 1], [], []>} : vector<8x16xbf16>, vector<16x256xbf16>, vector<8x256xf32> -> vector<8x256xf32>
    %161 = arith.addf %158, %160 : vector<8x256xf32>
    %162 = vector.extract_strided_slice %148 {offsets = [0, 0], sizes = [16, 256], strides = [1, 1]} : vector<16x384xbf16> to vector<16x256xbf16>
    %cst_109 = arith.constant dense<0.000000e+00> : vector<8x256xf32>
    %163 = tpu.matmul %9, %162, %cst_109 {dimension_numbers = #tpu.dot_dimension_numbers<[1], [0], [0], [1], [0, 0, 1, 1], [], []>} : vector<8x16xbf16>, vector<16x256xbf16>, vector<8x256xf32> -> vector<8x256xf32>
    %164 = arith.addf %161, %163 : vector<8x256xf32>
    %165 = vector.extract_strided_slice %148 {offsets = [0, 1], sizes = [16, 256], strides = [1, 1]} : vector<16x384xbf16> to vector<16x256xbf16>
    %cst_110 = arith.constant dense<0.000000e+00> : vector<8x256xf32>
    %166 = tpu.matmul %11, %165, %cst_110 {dimension_numbers = #tpu.dot_dimension_numbers<[1], [0], [0], [1], [0, 0, 1, 1], [], []>} : vector<8x16xbf16>, vector<16x256xbf16>, vector<8x256xf32> -> vector<8x256xf32>
    %167 = arith.addf %164, %166 : vector<8x256xf32>
    %168 = vector.extract_strided_slice %148 {offsets = [0, 13], sizes = [16, 256], strides = [1, 1]} : vector<16x384xbf16> to vector<16x256xbf16>
    %cst_111 = arith.constant dense<0.000000e+00> : vector<8x256xf32>
    %169 = tpu.matmul %13, %168, %cst_111 {dimension_numbers = #tpu.dot_dimension_numbers<[1], [0], [0], [1], [0, 0, 1, 1], [], []>} : vector<8x16xbf16>, vector<16x256xbf16>, vector<8x256xf32> -> vector<8x256xf32>
    %170 = arith.addf %167, %169 : vector<8x256xf32>
    %171 = vector.extract_strided_slice %148 {offsets = [0, 14], sizes = [16, 256], strides = [1, 1]} : vector<16x384xbf16> to vector<16x256xbf16>
    %cst_112 = arith.constant dense<0.000000e+00> : vector<8x256xf32>
    %172 = tpu.matmul %15, %171, %cst_112 {dimension_numbers = #tpu.dot_dimension_numbers<[1], [0], [0], [1], [0, 0, 1, 1], [], []>} : vector<8x16xbf16>, vector<16x256xbf16>, vector<8x256xf32> -> vector<8x256xf32>
    %173 = arith.addf %170, %172 : vector<8x256xf32>
    %c0_113 = arith.constant 0 : index
    %c4_114 = arith.constant 4 : index
    %c0_115 = arith.constant 0 : index
    %c0_116 = arith.constant 0 : index
    %174 = vector.load %arg4[%c0_113, %c4_114, %c0_115, %c0_116] : memref<1x8x8x256xf32, #tpu.memory_space<vmem>>, vector<1x1x8x256xf32>
    %175 = vector.shape_cast %174 : vector<1x1x8x256xf32> to vector<8x256xf32>
    %176 = vector.shape_cast %173 : vector<8x256xf32> to vector<1x1x8x256xf32>
    tpu.vector_store %arg4[%c0_113, %c4_114, %c0_115, %c0_116], %176 {strides = array<i32>} : memref<1x8x8x256xf32, #tpu.memory_space<vmem>>, vector<1x1x8x256xf32>,
    %c0_117 = arith.constant 0 : index
    %c5_118 = arith.constant 5 : index
    %c0_119 = arith.constant 0 : index
    %c0_120 = arith.constant 0 : index
    %177 = vector.load %arg1[%c0_117, %c5_118, %c0_119, %c0_120] : memref<1x9x16x384xbf16, #tpu.memory_space<vmem>>, vector<1x1x16x384xbf16>
    %178 = vector.shape_cast %177 : vector<1x1x16x384xbf16> to vector<16x384xbf16>
    %c0_121 = arith.constant 0 : index
    %c6_122 = arith.constant 6 : index
    %c0_123 = arith.constant 0 : index
    %c0_124 = arith.constant 0 : index
    %179 = vector.load %arg1[%c0_121, %c6_122, %c0_123, %c0_124] : memref<1x9x16x384xbf16, #tpu.memory_space<vmem>>, vector<1x1x16x384xbf16>
    %180 = vector.shape_cast %179 : vector<1x1x16x384xbf16> to vector<16x384xbf16>
    %181 = vector.extract_strided_slice %178 {offsets = [0, 0], sizes = [16, 256], strides = [1, 1]} : vector<16x384xbf16> to vector<16x256xbf16>
    %cst_125 = arith.constant dense<0.000000e+00> : vector<8x256xf32>
    %182 = tpu.matmul %1, %181, %cst_125 {dimension_numbers = #tpu.dot_dimension_numbers<[1], [0], [0], [1], [0, 0, 1, 1], [], []>} : vector<8x16xbf16>, vector<16x256xbf16>, vector<8x256xf32> -> vector<8x256xf32>
    %183 = vector.broadcast %16 : vector<8x1xf32> to vector<8x256xf32>
    %184 = arith.addf %183, %182 : vector<8x256xf32>
    %185 = vector.extract_strided_slice %178 {offsets = [0, 1], sizes = [16, 256], strides = [1, 1]} : vector<16x384xbf16> to vector<16x256xbf16>
    %cst_126 = arith.constant dense<0.000000e+00> : vector<8x256xf32>
    %186 = tpu.matmul %3, %185, %cst_126 {dimension_numbers = #tpu.dot_dimension_numbers<[1], [0], [0], [1], [0, 0, 1, 1], [], []>} : vector<8x16xbf16>, vector<16x256xbf16>, vector<8x256xf32> -> vector<8x256xf32>
    %187 = arith.addf %184, %186 : vector<8x256xf32>
    %188 = vector.extract_strided_slice %178 {offsets = [0, 13], sizes = [16, 256], strides = [1, 1]} : vector<16x384xbf16> to vector<16x256xbf16>
    %cst_127 = arith.constant dense<0.000000e+00> : vector<8x256xf32>
    %189 = tpu.matmul %5, %188, %cst_127 {dimension_numbers = #tpu.dot_dimension_numbers<[1], [0], [0], [1], [0, 0, 1, 1], [], []>} : vector<8x16xbf16>, vector<16x256xbf16>, vector<8x256xf32> -> vector<8x256xf32>
    %190 = arith.addf %187, %189 : vector<8x256xf32>
    %191 = vector.extract_strided_slice %178 {offsets = [0, 14], sizes = [16, 256], strides = [1, 1]} : vector<16x384xbf16> to vector<16x256xbf16>
    %cst_128 = arith.constant dense<0.000000e+00> : vector<8x256xf32>
    %192 = tpu.matmul %7, %191, %cst_128 {dimension_numbers = #tpu.dot_dimension_numbers<[1], [0], [0], [1], [0, 0, 1, 1], [], []>} : vector<8x16xbf16>, vector<16x256xbf16>, vector<8x256xf32> -> vector<8x256xf32>
    %193 = arith.addf %190, %192 : vector<8x256xf32>
    %194 = vector.extract_strided_slice %180 {offsets = [0, 0], sizes = [16, 256], strides = [1, 1]} : vector<16x384xbf16> to vector<16x256xbf16>
    %cst_129 = arith.constant dense<0.000000e+00> : vector<8x256xf32>
    %195 = tpu.matmul %9, %194, %cst_129 {dimension_numbers = #tpu.dot_dimension_numbers<[1], [0], [0], [1], [0, 0, 1, 1], [], []>} : vector<8x16xbf16>, vector<16x256xbf16>, vector<8x256xf32> -> vector<8x256xf32>
    %196 = arith.addf %193, %195 : vector<8x256xf32>
    %197 = vector.extract_strided_slice %180 {offsets = [0, 1], sizes = [16, 256], strides = [1, 1]} : vector<16x384xbf16> to vector<16x256xbf16>
    %cst_130 = arith.constant dense<0.000000e+00> : vector<8x256xf32>
    %198 = tpu.matmul %11, %197, %cst_130 {dimension_numbers = #tpu.dot_dimension_numbers<[1], [0], [0], [1], [0, 0, 1, 1], [], []>} : vector<8x16xbf16>, vector<16x256xbf16>, vector<8x256xf32> -> vector<8x256xf32>
    %199 = arith.addf %196, %198 : vector<8x256xf32>
    %200 = vector.extract_strided_slice %180 {offsets = [0, 13], sizes = [16, 256], strides = [1, 1]} : vector<16x384xbf16> to vector<16x256xbf16>
    %cst_131 = arith.constant dense<0.000000e+00> : vector<8x256xf32>
    %201 = tpu.matmul %13, %200, %cst_131 {dimension_numbers = #tpu.dot_dimension_numbers<[1], [0], [0], [1], [0, 0, 1, 1], [], []>} : vector<8x16xbf16>, vector<16x256xbf16>, vector<8x256xf32> -> vector<8x256xf32>
    %202 = arith.addf %199, %201 : vector<8x256xf32>
    %203 = vector.extract_strided_slice %180 {offsets = [0, 14], sizes = [16, 256], strides = [1, 1]} : vector<16x384xbf16> to vector<16x256xbf16>
    %cst_132 = arith.constant dense<0.000000e+00> : vector<8x256xf32>
    %204 = tpu.matmul %15, %203, %cst_132 {dimension_numbers = #tpu.dot_dimension_numbers<[1], [0], [0], [1], [0, 0, 1, 1], [], []>} : vector<8x16xbf16>, vector<16x256xbf16>, vector<8x256xf32> -> vector<8x256xf32>
    %205 = arith.addf %202, %204 : vector<8x256xf32>
    %c0_133 = arith.constant 0 : index
    %c5_134 = arith.constant 5 : index
    %c0_135 = arith.constant 0 : index
    %c0_136 = arith.constant 0 : index
    %206 = vector.load %arg4[%c0_133, %c5_134, %c0_135, %c0_136] : memref<1x8x8x256xf32, #tpu.memory_space<vmem>>, vector<1x1x8x256xf32>
    %207 = vector.shape_cast %206 : vector<1x1x8x256xf32> to vector<8x256xf32>
    %208 = vector.shape_cast %205 : vector<8x256xf32> to vector<1x1x8x256xf32>
    tpu.vector_store %arg4[%c0_133, %c5_134, %c0_135, %c0_136], %208 {strides = array<i32>} : memref<1x8x8x256xf32, #tpu.memory_space<vmem>>, vector<1x1x8x256xf32>,
    %c0_137 = arith.constant 0 : index
    %c6_138 = arith.constant 6 : index
    %c0_139 = arith.constant 0 : index
    %c0_140 = arith.constant 0 : index
    %209 = vector.load %arg1[%c0_137, %c6_138, %c0_139, %c0_140] : memref<1x9x16x384xbf16, #tpu.memory_space<vmem>>, vector<1x1x16x384xbf16>
    %210 = vector.shape_cast %209 : vector<1x1x16x384xbf16> to vector<16x384xbf16>
    %c0_141 = arith.constant 0 : index
    %c7_142 = arith.constant 7 : index
    %c0_143 = arith.constant 0 : index
    %c0_144 = arith.constant 0 : index
    %211 = vector.load %arg1[%c0_141, %c7_142, %c0_143, %c0_144] : memref<1x9x16x384xbf16, #tpu.memory_space<vmem>>, vector<1x1x16x384xbf16>
    %212 = vector.shape_cast %211 : vector<1x1x16x384xbf16> to vector<16x384xbf16>
    %213 = vector.extract_strided_slice %210 {offsets = [0, 0], sizes = [16, 256], strides = [1, 1]} : vector<16x384xbf16> to vector<16x256xbf16>
    %cst_145 = arith.constant dense<0.000000e+00> : vector<8x256xf32>
    %214 = tpu.matmul %1, %213, %cst_145 {dimension_numbers = #tpu.dot_dimension_numbers<[1], [0], [0], [1], [0, 0, 1, 1], [], []>} : vector<8x16xbf16>, vector<16x256xbf16>, vector<8x256xf32> -> vector<8x256xf32>
    %215 = vector.broadcast %16 : vector<8x1xf32> to vector<8x256xf32>
    %216 = arith.addf %215, %214 : vector<8x256xf32>
    %217 = vector.extract_strided_slice %210 {offsets = [0, 1], sizes = [16, 256], strides = [1, 1]} : vector<16x384xbf16> to vector<16x256xbf16>
    %cst_146 = arith.constant dense<0.000000e+00> : vector<8x256xf32>
    %218 = tpu.matmul %3, %217, %cst_146 {dimension_numbers = #tpu.dot_dimension_numbers<[1], [0], [0], [1], [0, 0, 1, 1], [], []>} : vector<8x16xbf16>, vector<16x256xbf16>, vector<8x256xf32> -> vector<8x256xf32>
    %219 = arith.addf %216, %218 : vector<8x256xf32>
    %220 = vector.extract_strided_slice %210 {offsets = [0, 13], sizes = [16, 256], strides = [1, 1]} : vector<16x384xbf16> to vector<16x256xbf16>
    %cst_147 = arith.constant dense<0.000000e+00> : vector<8x256xf32>
    %221 = tpu.matmul %5, %220, %cst_147 {dimension_numbers = #tpu.dot_dimension_numbers<[1], [0], [0], [1], [0, 0, 1, 1], [], []>} : vector<8x16xbf16>, vector<16x256xbf16>, vector<8x256xf32> -> vector<8x256xf32>
    %222 = arith.addf %219, %221 : vector<8x256xf32>
    %223 = vector.extract_strided_slice %210 {offsets = [0, 14], sizes = [16, 256], strides = [1, 1]} : vector<16x384xbf16> to vector<16x256xbf16>
    %cst_148 = arith.constant dense<0.000000e+00> : vector<8x256xf32>
    %224 = tpu.matmul %7, %223, %cst_148 {dimension_numbers = #tpu.dot_dimension_numbers<[1], [0], [0], [1], [0, 0, 1, 1], [], []>} : vector<8x16xbf16>, vector<16x256xbf16>, vector<8x256xf32> -> vector<8x256xf32>
    %225 = arith.addf %222, %224 : vector<8x256xf32>
    %226 = vector.extract_strided_slice %212 {offsets = [0, 0], sizes = [16, 256], strides = [1, 1]} : vector<16x384xbf16> to vector<16x256xbf16>
    %cst_149 = arith.constant dense<0.000000e+00> : vector<8x256xf32>
    %227 = tpu.matmul %9, %226, %cst_149 {dimension_numbers = #tpu.dot_dimension_numbers<[1], [0], [0], [1], [0, 0, 1, 1], [], []>} : vector<8x16xbf16>, vector<16x256xbf16>, vector<8x256xf32> -> vector<8x256xf32>
    %228 = arith.addf %225, %227 : vector<8x256xf32>
    %229 = vector.extract_strided_slice %212 {offsets = [0, 1], sizes = [16, 256], strides = [1, 1]} : vector<16x384xbf16> to vector<16x256xbf16>
    %cst_150 = arith.constant dense<0.000000e+00> : vector<8x256xf32>
    %230 = tpu.matmul %11, %229, %cst_150 {dimension_numbers = #tpu.dot_dimension_numbers<[1], [0], [0], [1], [0, 0, 1, 1], [], []>} : vector<8x16xbf16>, vector<16x256xbf16>, vector<8x256xf32> -> vector<8x256xf32>
    %231 = arith.addf %228, %230 : vector<8x256xf32>
    %232 = vector.extract_strided_slice %212 {offsets = [0, 13], sizes = [16, 256], strides = [1, 1]} : vector<16x384xbf16> to vector<16x256xbf16>
    %cst_151 = arith.constant dense<0.000000e+00> : vector<8x256xf32>
    %233 = tpu.matmul %13, %232, %cst_151 {dimension_numbers = #tpu.dot_dimension_numbers<[1], [0], [0], [1], [0, 0, 1, 1], [], []>} : vector<8x16xbf16>, vector<16x256xbf16>, vector<8x256xf32> -> vector<8x256xf32>
    %234 = arith.addf %231, %233 : vector<8x256xf32>
    %235 = vector.extract_strided_slice %212 {offsets = [0, 14], sizes = [16, 256], strides = [1, 1]} : vector<16x384xbf16> to vector<16x256xbf16>
    %cst_152 = arith.constant dense<0.000000e+00> : vector<8x256xf32>
    %236 = tpu.matmul %15, %235, %cst_152 {dimension_numbers = #tpu.dot_dimension_numbers<[1], [0], [0], [1], [0, 0, 1, 1], [], []>} : vector<8x16xbf16>, vector<16x256xbf16>, vector<8x256xf32> -> vector<8x256xf32>
    %237 = arith.addf %234, %236 : vector<8x256xf32>
    %c0_153 = arith.constant 0 : index
    %c6_154 = arith.constant 6 : index
    %c0_155 = arith.constant 0 : index
    %c0_156 = arith.constant 0 : index
    %238 = vector.load %arg4[%c0_153, %c6_154, %c0_155, %c0_156] : memref<1x8x8x256xf32, #tpu.memory_space<vmem>>, vector<1x1x8x256xf32>
    %239 = vector.shape_cast %238 : vector<1x1x8x256xf32> to vector<8x256xf32>
    %240 = vector.shape_cast %237 : vector<8x256xf32> to vector<1x1x8x256xf32>
    tpu.vector_store %arg4[%c0_153, %c6_154, %c0_155, %c0_156], %240 {strides = array<i32>} : memref<1x8x8x256xf32, #tpu.memory_space<vmem>>, vector<1x1x8x256xf32>,
    %c0_157 = arith.constant 0 : index
    %c7_158 = arith.constant 7 : index
    %c0_159 = arith.constant 0 : index
    %c0_160 = arith.constant 0 : index
    %241 = vector.load %arg1[%c0_157, %c7_158, %c0_159, %c0_160] : memref<1x9x16x384xbf16, #tpu.memory_space<vmem>>, vector<1x1x16x384xbf16>
    %242 = vector.shape_cast %241 : vector<1x1x16x384xbf16> to vector<16x384xbf16>
    %c0_161 = arith.constant 0 : index
    %c8 = arith.constant 8 : index
    %c0_162 = arith.constant 0 : index
    %c0_163 = arith.constant 0 : index
    %243 = vector.load %arg1[%c0_161, %c8, %c0_162, %c0_163] : memref<1x9x16x384xbf16, #tpu.memory_space<vmem>>, vector<1x1x16x384xbf16>
    %244 = vector.shape_cast %243 : vector<1x1x16x384xbf16> to vector<16x384xbf16>
    %245 = vector.extract_strided_slice %242 {offsets = [0, 0], sizes = [16, 256], strides = [1, 1]} : vector<16x384xbf16> to vector<16x256xbf16>
    %cst_164 = arith.constant dense<0.000000e+00> : vector<8x256xf32>
    %246 = tpu.matmul %1, %245, %cst_164 {dimension_numbers = #tpu.dot_dimension_numbers<[1], [0], [0], [1], [0, 0, 1, 1], [], []>} : vector<8x16xbf16>, vector<16x256xbf16>, vector<8x256xf32> -> vector<8x256xf32>
    %247 = vector.broadcast %16 : vector<8x1xf32> to vector<8x256xf32>
    %248 = arith.addf %247, %246 : vector<8x256xf32>
    %249 = vector.extract_strided_slice %242 {offsets = [0, 1], sizes = [16, 256], strides = [1, 1]} : vector<16x384xbf16> to vector<16x256xbf16>
    %cst_165 = arith.constant dense<0.000000e+00> : vector<8x256xf32>
    %250 = tpu.matmul %3, %249, %cst_165 {dimension_numbers = #tpu.dot_dimension_numbers<[1], [0], [0], [1], [0, 0, 1, 1], [], []>} : vector<8x16xbf16>, vector<16x256xbf16>, vector<8x256xf32> -> vector<8x256xf32>
    %251 = arith.addf %248, %250 : vector<8x256xf32>
    %252 = vector.extract_strided_slice %242 {offsets = [0, 13], sizes = [16, 256], strides = [1, 1]} : vector<16x384xbf16> to vector<16x256xbf16>
    %cst_166 = arith.constant dense<0.000000e+00> : vector<8x256xf32>
    %253 = tpu.matmul %5, %252, %cst_166 {dimension_numbers = #tpu.dot_dimension_numbers<[1], [0], [0], [1], [0, 0, 1, 1], [], []>} : vector<8x16xbf16>, vector<16x256xbf16>, vector<8x256xf32> -> vector<8x256xf32>
    %254 = arith.addf %251, %253 : vector<8x256xf32>
    %255 = vector.extract_strided_slice %242 {offsets = [0, 14], sizes = [16, 256], strides = [1, 1]} : vector<16x384xbf16> to vector<16x256xbf16>
    %cst_167 = arith.constant dense<0.000000e+00> : vector<8x256xf32>
    %256 = tpu.matmul %7, %255, %cst_167 {dimension_numbers = #tpu.dot_dimension_numbers<[1], [0], [0], [1], [0, 0, 1, 1], [], []>} : vector<8x16xbf16>, vector<16x256xbf16>, vector<8x256xf32> -> vector<8x256xf32>
    %257 = arith.addf %254, %256 : vector<8x256xf32>
    %258 = vector.extract_strided_slice %244 {offsets = [0, 0], sizes = [16, 256], strides = [1, 1]} : vector<16x384xbf16> to vector<16x256xbf16>
    %cst_168 = arith.constant dense<0.000000e+00> : vector<8x256xf32>
    %259 = tpu.matmul %9, %258, %cst_168 {dimension_numbers = #tpu.dot_dimension_numbers<[1], [0], [0], [1], [0, 0, 1, 1], [], []>} : vector<8x16xbf16>, vector<16x256xbf16>, vector<8x256xf32> -> vector<8x256xf32>
    %260 = arith.addf %257, %259 : vector<8x256xf32>
    %261 = vector.extract_strided_slice %244 {offsets = [0, 1], sizes = [16, 256], strides = [1, 1]} : vector<16x384xbf16> to vector<16x256xbf16>
    %cst_169 = arith.constant dense<0.000000e+00> : vector<8x256xf32>
    %262 = tpu.matmul %11, %261, %cst_169 {dimension_numbers = #tpu.dot_dimension_numbers<[1], [0], [0], [1], [0, 0, 1, 1], [], []>} : vector<8x16xbf16>, vector<16x256xbf16>, vector<8x256xf32> -> vector<8x256xf32>
    %263 = arith.addf %260, %262 : vector<8x256xf32>
    %264 = vector.extract_strided_slice %244 {offsets = [0, 13], sizes = [16, 256], strides = [1, 1]} : vector<16x384xbf16> to vector<16x256xbf16>
    %cst_170 = arith.constant dense<0.000000e+00> : vector<8x256xf32>
    %265 = tpu.matmul %13, %264, %cst_170 {dimension_numbers = #tpu.dot_dimension_numbers<[1], [0], [0], [1], [0, 0, 1, 1], [], []>} : vector<8x16xbf16>, vector<16x256xbf16>, vector<8x256xf32> -> vector<8x256xf32>
    %266 = arith.addf %263, %265 : vector<8x256xf32>
    %267 = vector.extract_strided_slice %244 {offsets = [0, 14], sizes = [16, 256], strides = [1, 1]} : vector<16x384xbf16> to vector<16x256xbf16>
    %cst_171 = arith.constant dense<0.000000e+00> : vector<8x256xf32>
    %268 = tpu.matmul %15, %267, %cst_171 {dimension_numbers = #tpu.dot_dimension_numbers<[1], [0], [0], [1], [0, 0, 1, 1], [], []>} : vector<8x16xbf16>, vector<16x256xbf16>, vector<8x256xf32> -> vector<8x256xf32>
    %269 = arith.addf %266, %268 : vector<8x256xf32>
    %c0_172 = arith.constant 0 : index
    %c7_173 = arith.constant 7 : index
    %c0_174 = arith.constant 0 : index
    %c0_175 = arith.constant 0 : index
    %270 = vector.load %arg4[%c0_172, %c7_173, %c0_174, %c0_175] : memref<1x8x8x256xf32, #tpu.memory_space<vmem>>, vector<1x1x8x256xf32>
    %271 = vector.shape_cast %270 : vector<1x1x8x256xf32> to vector<8x256xf32>
    %272 = vector.shape_cast %269 : vector<8x256xf32> to vector<1x1x8x256xf32>
    tpu.vector_store %arg4[%c0_172, %c7_173, %c0_174, %c0_175], %272 {strides = array<i32>} : memref<1x8x8x256xf32, #tpu.memory_space<vmem>>, vector<1x1x8x256xf32>,
    return
  }
  func.func @transform_0(%arg0: i32) -> (i32, i32, i32, i32) {
    %c0_i32 = arith.constant 0 : i32
    %c0_i32_0 = arith.constant 0 : i32
    %c0_i32_1 = arith.constant 0 : i32
    %c0_i32_2 = arith.constant 0 : i32
    return %arg0, %c0_i32, %c0_i32_0, %c0_i32_1 : i32, i32, i32, i32
  }
  func.func @transform_1(%arg0: i32) -> (i32, i32, i32) {
    %c0_i32 = arith.constant 0 : i32
    %c0_i32_0 = arith.constant 0 : i32
    %c0_i32_1 = arith.constant 0 : i32
    %c0_i32_2 = arith.constant 0 : i32
    return %c0_i32, %c0_i32_0, %c0_i32_1 : i32, i32, i32
  }
  func.func @transform_2(%arg0: i32) -> (i32, i32) {
    %c0_i32 = arith.constant 0 : i32
    %c0_i32_0 = arith.constant 0 : i32
    %c0_i32_1 = arith.constant 0 : i32
    return %c0_i32, %c0_i32_0 : i32, i32
  }
  func.func @transform_3(%arg0: i32) -> (i32, i32, i32, i32) {
    %c0_i32 = arith.constant 0 : i32
    %c0_i32_0 = arith.constant 0 : i32
    %c0_i32_1 = arith.constant 0 : i32
    %c0_i32_2 = arith.constant 0 : i32
    return %arg0, %c0_i32, %c0_i32_0, %c0_i32_1 : i32, i32, i32, i32
  }
}

</mosaic_0001>

<bundles_post_ra>
// kernel: unet3d_upconv_forward.1
= control target key start
LH: loop header
LB: loop body
LE: loop exit
PB: predicated region body
PF: predicated region fallthrough
CT: control target
= control target key end

     0   :  { %s4377_s12 = smov 0   ;;  %s5234_s0 = inlined_call_operand.vmem [shape: bf16[2,9,16,384], index: 0, kind: input, shape index: {}]   ;;  %s5235_s1 = inlined_call_operand.vmem [shape: bf16[8,8,16], index: 1, kind: input, shape index: {}]   ;;  %s5236_s2 = inlined_call_operand.vmem [shape: f32[8,1], index: 2, kind: input, shape index: {}]   ;;  %s5237_s3 = inlined_call_operand.vmem [shape: f32[2,8,8,256], index: 3, kind: output, shape index: {}]  }
   0x1 LB: > { %s3843_s13 = sadd.s32 4294967295, %s4351_s12   ;;  %p3847_p0 = scmp.ge.s32.totalorder %s4351_s12, 1  ;;  %s4351_s12 = sphi %s4377_s12, %s13_s12  }
   0x2   : > { %p137_p1 = scmp.lt.s32.totalorder %s4351_s12, 3 }
   0x4   : > { %p138_p2 = pnand %p3847_p0, %p137_p1 }
   0x5   : > { %p161_p3 = scmp.lt.s32.totalorder (!%p138_p2), %s3843_s13, 1  ;;  %v4353_v0 = vmov (!%p138_p2), 0   ;;  %s4354_s18 = smov (!%p138_p2), 127   ;;  %v4412_v6 = vld [vmem:[%s5235_s1] sm:$0xf] (!%p138_p2)  ;;  %vm207_vm0 = vcmask (!%p138_p2), 130048  }
   0x6   : > { %141 = sbr.rel (%p138_p2) target bundleno = 710 (0x2c6), region = 32  ;;  %243 = vmatprep.mubr.bf16.mxu0 (!%p138_p2), %v4353_v0  ;;  %717 = vmatprep.mubr.bf16.mxu1 (!%p138_p2), %v4353_v0  ;;  %s4355_s21 = smov (!%p138_p2), 115   ;;  %vm270_vm1 = vcmask (!%p138_p2), 1039360   ;;  %v4547_v30 = vld [vmem:[%s5235_s1 + $0x4] sm:$0xf] (!%p138_p2)  ;;  %vm327_vm2 = vcmask (!%p138_p2), 941056  }
   0x7   : > { %4300 = vset.pattern.permute.xlu0 (!%p138_p2), %v4353_v0  ;;  %s4356_s22 = smov (!%p138_p2), 114   ;;  %v4572_v41 = vld [vmem:[%s5235_s1 + $0x8] sm:$0xf] (!%p138_p2)  ;;  %vm384_vm3 = vcmask (!%p138_p2), 932864   ;;  %v4605_v55 = vld [vmem:[%s5235_s1 + $0xc] sm:$0xf] (!%p138_p2) }
   0xd   : > { %s5239_s13 = smov (!%p161_p3, %s3843_s13), 1 }
   0xe   : > { %s4287_s14 = smul.u32 216, %s5239_s13  ;;  %s4046_s16 = sshll.u32 %s5239_s13, 7 }
   0xf   : > { %s5132_s19 = scalar_lea.vmem %s5237_s3, %s4046_s16 }
  0x10   : > { %s4394_s17 = scalar_lea.vmem %s5234_s0, %s4287_s14 }
  0x11   : > { %v4397_v1 = vld [vmem:[%s4394_s17 + $0x1c] ss:$12 sps:$4 sm:$0xff]   ;;  %v4303_v2 = vld [vmem:[%s4394_s17 + $0x4] ss:$12 sps:$4 sm:$0xff]   ;;  %v4305_v3 = vld [vmem:[%s4394_s17 + $0x20] ss:$12 sps:$4 sm:$0xff]  }
  0x12   : > { %735 = vrot.lane.b32.xlu1 %v4397_v1, %s4354_s18  ;;  %685 = vmatprep.subr.bf16.mxu1 %v4397_v1  ;;  %v4306_v4 = vld [vmem:[%s4394_s17 + $0x8] ss:$12 sps:$4 sm:$0xff]   ;;  %v4407_v5 = vld [vmem:[%s4394_s17 + $0x18] ss:$12 sps:$4 sm:$0xff]   ;;  %v4308_v7 = vld [vmem:[%s4394_s17] ss:$12 sps:$4 sm:$0xff]  }
  0x13   : > { %266 = vrot.lane.b32.xlu0 %v4303_v2, %s4354_s18  ;;  %211 = vmatprep.subr.bf16.mxu0 %v4303_v2  ;;  %v4311_v8 = vld [vmem:[%s4394_s17 + $0x20] ss:$12 sps:$4 sm:$0xff]   ;;  %v4312_v9 = vld [vmem:[%s4394_s17 + $0x38] ss:$12 sps:$4 sm:$0xff]   ;;  %v4453_v11 = vld [vmem:[%s4394_s17 + $0x30] ss:$12 sps:$4 sm:$0xff]  }
  0x14   : > { %686 = vmatpush1.bf16.msra.mxu1 %v4407_v5  ;;  %212 = vmatpush1.bf16.msra.mxu0 %v4308_v7  ;;  %v4449_v10 = vld [vmem:[%s4394_s17 + $0x34] ss:$12 sps:$4 sm:$0xff]   ;;  %v4316_v12 = vld [vmem:[%s4394_s17 + $0x38] ss:$12 sps:$4 sm:$0xff]   ;;  %v4317_v13 = vld [vmem:[%s4394_s17 + $0x50] ss:$12 sps:$4 sm:$0xff]  }
  0x15   : > { %v4487_v14 = vld [vmem:[%s4394_s17 + $0x4c] ss:$12 sps:$4 sm:$0xff]   ;;  %v4491_v15 = vld [vmem:[%s4394_s17 + $0x48] ss:$12 sps:$4 sm:$0xff]   ;;  %v4321_v16 = vld [vmem:[%s4394_s17 + $0x50] ss:$12 sps:$4 sm:$0xff]  }
  0x16   : > { %737 = vrot.lane.b32.xlu1 %v4305_v3, %s4354_s18  ;;  %v4322_v17 = vld [vmem:[%s4394_s17 + $0x68] ss:$12 sps:$4 sm:$0xff]   ;;  %v4525_v18 = vld [vmem:[%s4394_s17 + $0x64] ss:$12 sps:$4 sm:$0xff]   ;;  %v4529_v19 = vld [vmem:[%s4394_s17 + $0x60] ss:$12 sps:$4 sm:$0xff]  }
  0x17   : > { %268 = vrot.lane.b32.xlu0 %v4306_v4, %s4354_s18  ;;  %3886 = vmatmul.mubr.msk.bf16.vlgmr.msra.gmra.mrb[0].mxu1 %vm207_vm0, %v4412_v6  ;;  %v4589_v46 = vld [vmem:[%s4394_s17 + $0x68] ss:$12 sps:$4 sm:$0xff]   ;;  %v4327_v53 = vld [vmem:[%s4394_s17 + $0x80] ss:$12 sps:$4 sm:$0xff]   ;;  %v4615_v58 = vld [vmem:[%s4394_s17 + $0x78] ss:$12 sps:$4 sm:$0xff]  }
  0x18   : > { %3864 = vmatmul.mubr.msk.bf16.vlgmr.msra.gmra.mrb[0].mxu0 %vm207_vm0, %v4412_v6  ;;  %775 = vmatprep.mubr.bf16.mxu1 %v4353_v0  ;;  %v4595_v49 = vld [vmem:[%s4394_s17 + $0x7c] ss:$12 sps:$4 sm:$0xff]  }
  0x19   : > { %310 = vmatprep.mubr.bf16.mxu0 %v4353_v0 }
  0x1a   : > { %733 = vrot.lane.b32.xlu1 %v4407_v5, %s4354_s18 }
  0x1b   : > { %264 = vrot.lane.b32.xlu0 %v4308_v7, %s4354_s18 }
  0x1e   : > { %325 = vrot.lane.b32.xlu1 %v4306_v4, %s4355_s21 }
  0x1f   : > { %323 = vrot.lane.b32.xlu0 %v4303_v2, %s4355_s21 }
  0x22   : > { %790 = vrot.lane.b32.xlu1 %v4305_v3, %s4355_s21 }
  0x23   : > { %788 = vrot.lane.b32.xlu0 %v4397_v1, %s4355_s21 }
  0x26   : > { %786 = vrot.lane.b32.xlu1 %v4407_v5, %s4355_s21 }
  0x27   : > { %321 = vrot.lane.b32.xlu0 %v4308_v7, %s4355_s21 }
  0x2a   : > { %382 = vrot.lane.b32.xlu1 %v4306_v4, %s4356_s22 }
  0x2b   : > { %380 = vrot.lane.b32.xlu0 %v4303_v2, %s4356_s22  ;;  %v4636_v2 = vld [vmem:[%s5235_s1 + $0x10] sm:$0xf] }
  0x2e   : > { %843 = vrot.lane.b32.xlu1 %v4305_v3, %s4356_s22 }
  0x2f   : > { %841 = vrot.lane.b32.xlu0 %v4397_v1, %s4356_s22 }
  0x32   : > { %839 = vrot.lane.b32.xlu1 %v4407_v5, %s4356_s22 }
  0x33   : > { %378 = vrot.lane.b32.xlu0 %v4308_v7, %s4356_s22 }
  0x36   : > { %500 = vrot.lane.b32.xlu1 %v4311_v8, %s4354_s18 }
  0x37   : > { %498 = vrot.lane.b32.xlu0 %v4397_v1, %s4354_s18 }
  0x3a   : > { %954 = vrot.lane.b32.xlu1 %v4312_v9, %s4354_s18 }
  0x3b   : > { %952 = vrot.lane.b32.xlu0 %v4449_v10, %s4354_s18 }
  0x3e   : > { %950 = vrot.lane.b32.xlu1 %v4453_v11, %s4354_s18 }
  0x3f   : > { %496 = vrot.lane.b32.xlu0 %v4407_v5, %s4354_s18 }
  0x42   : > { %556 = vrot.lane.b32.xlu1 %v4311_v8, %s4355_s21 }
  0x43   : > { %554 = vrot.lane.b32.xlu0 %v4397_v1, %s4355_s21 }
  0x46   : > { %1007 = vrot.lane.b32.xlu1 %v4312_v9, %s4355_s21 }
  0x47   : > { %1005 = vrot.lane.b32.xlu0 %v4449_v10, %s4355_s21 }
  0x4a   : > { %1003 = vrot.lane.b32.xlu1 %v4453_v11, %s4355_s21 }
  0x4b   : > { %552 = vrot.lane.b32.xlu0 %v4407_v5, %s4355_s21 }
  0x4e   : > { %612 = vrot.lane.b32.xlu1 %v4311_v8, %s4356_s22 }
  0x4f   : > { %610 = vrot.lane.b32.xlu0 %v4397_v1, %s4356_s22 }
  0x52   : > { %1060 = vrot.lane.b32.xlu1 %v4312_v9, %s4356_s22 }
  0x53   : > { %1058 = vrot.lane.b32.xlu0 %v4449_v10, %s4356_s22 }
  0x56   : > { %1056 = vrot.lane.b32.xlu1 %v4453_v11, %s4356_s22 }
  0x57   : > { %608 = vrot.lane.b32.xlu0 %v4407_v5, %s4356_s22 }
  0x5a   : > { %1183 = vrot.lane.b32.xlu1 %v4316_v12, %s4354_s18 }
  0x5b   : > { %1181 = vrot.lane.b32.xlu0 %v4449_v10, %s4354_s18 }
  0x5e   : > { %1629 = vrot.lane.b32.xlu1 %v4317_v13, %s4354_s18 }
  0x5f   : > { %1627 = vrot.lane.b32.xlu0 %v4487_v14, %s4354_s18 }
  0x62   : > { %1625 = vrot.lane.b32.xlu1 %v4491_v15, %s4354_s18 }
  0x63   : > { %1179 = vrot.lane.b32.xlu0 %v4453_v11, %s4354_s18 }
  0x66   : > { %1236 = vrot.lane.b32.xlu1 %v4316_v12, %s4355_s21 }
  0x67   : > { %1234 = vrot.lane.b32.xlu0 %v4449_v10, %s4355_s21 }
  0x6a   : > { %1682 = vrot.lane.b32.xlu1 %v4317_v13, %s4355_s21 }
  0x6b   : > { %1680 = vrot.lane.b32.xlu0 %v4487_v14, %s4355_s21 }
  0x6e   : > { %1678 = vrot.lane.b32.xlu1 %v4491_v15, %s4355_s21 }
  0x6f   : > { %1232 = vrot.lane.b32.xlu0 %v4453_v11, %s4355_s21 }
  0x72   : > { %1289 = vrot.lane.b32.xlu1 %v4316_v12, %s4356_s22 }
  0x73   : > { %1287 = vrot.lane.b32.xlu0 %v4449_v10, %s4356_s22 }
  0x76   : > { %1735 = vrot.lane.b32.xlu1 %v4317_v13, %s4356_s22 }
  0x77   : > { %1733 = vrot.lane.b32.xlu0 %v4487_v14, %s4356_s22 }
  0x7a   : > { %1731 = vrot.lane.b32.xlu1 %v4491_v15, %s4356_s22 }
  0x7b   : > { %1285 = vrot.lane.b32.xlu0 %v4453_v11, %s4356_s22 }
  0x7e   : > { %1400 = vrot.lane.b32.xlu1 %v4321_v16, %s4354_s18 }
  0x7f   : > { %1398 = vrot.lane.b32.xlu0 %v4487_v14, %s4354_s18 }
  0x82   : > { %1846 = vrot.lane.b32.xlu1 %v4322_v17, %s4354_s18 }
  0x83   : > { %1844 = vrot.lane.b32.xlu0 %v4525_v18, %s4354_s18 }
  0x84   : > { %v736_v20 = vpop.permute.xlu1 %735 }
  0x85   : > { %v267_v21 = vpop.permute.xlu0 %266 }
  0x86   : > { %1842 = vrot.lane.b32.xlu1 %v4529_v19, %s4354_s18 }
  0x87   : > { %1396 = vrot.lane.b32.xlu0 %v4491_v15, %s4354_s18 }
  0x88   : > { %v738_v22 = vpop.permute.xlu1 %737 }
  0x89   : > { %v269_v23 = vpop.permute.xlu0 %268  ;;  %v740_v24 = vsel %vm270_vm1, %v736_v20, %v738_v22 }
  0x8a   : > { %743 = vmatprep.subr.bf16.mxu1 %v740_v24  ;;  %v272_v25 = vsel %vm270_vm1, %v267_v21, %v269_v23  ;;  %1453 = vrot.lane.b32.xlu1 %v4321_v16, %s4355_s21 }
  0x8b   : > { %1451 = vrot.lane.b32.xlu0 %v4487_v14, %s4355_s21  ;;  %278 = vmatprep.subr.bf16.mxu0 %v272_v25 }
  0x8c   : > { %v734_v26 = vpop.permute.xlu1 %733 }
  0x8d   : > { %v739_v27 = vsel %vm270_vm1, %v734_v26, %v736_v20  ;;  %v265_v28 = vpop.permute.xlu0 %264  ;;  %v4662_v20 = vld [vmem:[%s5235_s1 + $0x14] sm:$0xf] }
  0x8e   : > { %v271_v29 = vsel %vm270_vm1, %v265_v28, %v267_v21  ;;  %744 = vmatpush1.bf16.msra.mxu1 %v739_v27  ;;  %1899 = vrot.lane.b32.xlu1 %v4322_v17, %s4355_s21  ;;  %v4681_v28 = vld [vmem:[%s4394_s17 + $0x80] ss:$12 sps:$4 sm:$0xff]  }
  0x8f   : > { %1897 = vrot.lane.b32.xlu0 %v4525_v18, %s4355_s21  ;;  %279 = vmatpush1.bf16.msra.mxu0 %v271_v29 }
  0x90   : > { %v326_v31 = vpop.permute.xlu1 %325 }
  0x91   : > { %v324_v32 = vpop.permute.xlu0 %323  ;;  %3888 = vmatmul.mubr.msk.bf16.vlgmr.msra.gmra.mrb[0].mxu1 %vm207_vm0, %v4547_v30 }
  0x92   : > { %3866 = vmatmul.mubr.msk.bf16.vlgmr.msra.gmra.mrb[0].mxu0 %vm207_vm0, %v4547_v30  ;;  %v329_v33 = vsel %vm327_vm2, %v324_v32, %v326_v31  ;;  %828 = vmatprep.mubr.bf16.mxu1 %v4353_v0  ;;  %v4687_v31 = vld [vmem:[%s4394_s17 + $0x94] ss:$12 sps:$4 sm:$0xff]  }
  0x93   : > { %1449 = vrot.lane.b32.xlu0 %v4491_v15, %s4355_s21  ;;  %335 = vmatprep.subr.bf16.mxu0 %v329_v33 }
  0x94   : > { %v791_v34 = vpop.permute.xlu1 %790  ;;  %367 = vmatprep.mubr.bf16.mxu0 %v4353_v0  ;;  %1895 = vrot.lane.b32.xlu1 %v4529_v19, %s4355_s21 }
  0x95   : > { %v789_v35 = vpop.permute.xlu0 %788 }
  0x96   : > { %v793_v36 = vsel %vm327_vm2, %v789_v35, %v791_v34  ;;  %v4692_v34 = vld [vmem:[%s4394_s17 + $0x98] ss:$12 sps:$4 sm:$0xff]  }
  0x97   : > { %1504 = vrot.lane.b32.xlu0 %v4487_v14, %s4356_s22  ;;  %796 = vmatprep.subr.bf16.mxu1 %v793_v36 }
  0x98   : > { %v787_v37 = vpop.permute.xlu1 %786  ;;  %1506 = vrot.lane.b32.xlu1 %v4321_v16, %s4356_s22 }
  0x99   : > { %v792_v38 = vsel %vm327_vm2, %v787_v37, %v789_v35  ;;  %v322_v39 = vpop.permute.xlu0 %321  ;;  %v4697_v35 = vld [vmem:[%s5235_s1 + $0x18] sm:$0xf] }
  0x9a   : > { %v328_v40 = vsel %vm327_vm2, %v322_v39, %v324_v32  ;;  %797 = vmatpush1.bf16.msra.mxu1 %v792_v38 }
  0x9b   : > { %1950 = vrot.lane.b32.xlu0 %v4525_v18, %s4356_s22  ;;  %336 = vmatpush1.bf16.msra.mxu0 %v328_v40 }
  0x9c   : > { %v383_v42 = vpop.permute.xlu1 %382  ;;  %1952 = vrot.lane.b32.xlu1 %v4322_v17, %s4356_s22 }
  0x9d   : > { %v381_v43 = vpop.permute.xlu0 %380  ;;  %3889 = vmatmul.mubr.msk.bf16.vlgmr.msra.gmra.mrb[0].mxu1 %vm207_vm0, %v4572_v41 }
  0x9e   : > { %3867 = vmatmul.mubr.msk.bf16.vlgmr.msra.gmra.mrb[0].mxu0 %vm207_vm0, %v4572_v41  ;;  %v386_v44 = vsel %vm384_vm3, %v381_v43, %v383_v42  ;;  %881 = vmatprep.mubr.bf16.mxu1 %v4353_v0  ;;  %v4714_v42 = vld [vmem:[%s4394_s17 + $0x90] ss:$12 sps:$4 sm:$0xff]  }
  0x9f   : > { %1502 = vrot.lane.b32.xlu0 %v4491_v15, %s4356_s22  ;;  %392 = vmatprep.subr.bf16.mxu0 %v386_v44 }
  0xa0   : > { %v844_v45 = vpop.permute.xlu1 %843  ;;  %424 = vmatprep.mubr.bf16.mxu0 %v4353_v0  ;;  %1948 = vrot.lane.b32.xlu1 %v4529_v19, %s4356_s22 }
  0xa1   : > { %v842_v47 = vpop.permute.xlu0 %841 }
  0xa2   : > { %v846_v48 = vsel %vm384_vm3, %v842_v47, %v844_v45 }
  0xa3   : > { %2073 = vrot.lane.b32.xlu0 %v4525_v18, %s4354_s18  ;;  %849 = vmatprep.subr.bf16.mxu1 %v846_v48 }
  0xa4   : > { %v840_v50 = vpop.permute.xlu1 %839  ;;  %2075 = vrot.lane.b32.xlu1 %v4589_v46, %s4354_s18 }
  0xa5   : > { %v845_v51 = vsel %vm384_vm3, %v840_v50, %v842_v47  ;;  %v379_v52 = vpop.permute.xlu0 %378 }
  0xa6   : > { %v385_v54 = vsel %vm384_vm3, %v379_v52, %v381_v43  ;;  %850 = vmatpush1.bf16.msra.mxu1 %v845_v51 }
  0xa7   : > { %2519 = vrot.lane.b32.xlu0 %v4595_v49, %s4354_s18  ;;  %393 = vmatpush1.bf16.msra.mxu0 %v385_v54 }
  0xa8   : > { %v501_v56 = vpop.permute.xlu1 %500  ;;  %448 = vmatprep.subr.bf16.mxu0 %v4397_v1  ;;  %902 = vmatprep.subr.bf16.mxu1 %v4449_v10 }
  0xa9   : > { %3890 = vmatmul.mubr.msk.bf16.vlgmr.msra.gmra.mrb[0].mxu1 %vm207_vm0, %v4605_v55  ;;  %v499_v57 = vpop.permute.xlu0 %498  ;;  %2521 = vrot.lane.b32.xlu1 %v4327_v53, %s4354_s18 }
  0xaa   : > { %3868 = vmatmul.mubr.msk.bf16.vlgmr.msra.gmra.mrb[0].mxu0 %vm207_vm0, %v4605_v55  ;;  %903 = vmatpush1.bf16.msra.mxu1 %v4453_v11  ;;  %v503_v59 = vsel %vm270_vm1, %v499_v57, %v501_v56 }
  0xab   : > { %2071 = vrot.lane.b32.xlu0 %v4529_v19, %s4354_s18  ;;  %449 = vmatpush1.bf16.msra.mxu0 %v4407_v5 }
  0xac   : > { %v955_v60 = vpop.permute.xlu1 %954  ;;  %934 = vmatprep.mubr.bf16.mxu1 %v4353_v0  ;;  %480 = vmatprep.mubr.bf16.mxu0 %v4353_v0 }
  0xad   : > { %v953_v61 = vpop.permute.xlu0 %952  ;;  %509 = vmatprep.subr.bf16.mxu0 %v503_v59  ;;  %2517 = vrot.lane.b32.xlu1 %v4615_v58, %s4354_s18 }
  0xae   : > { %v957_v62 = vsel %vm270_vm1, %v953_v61, %v955_v60 }
  0xaf   : > { %2126 = vrot.lane.b32.xlu0 %v4525_v18, %s4355_s21  ;;  %960 = vmatprep.subr.bf16.mxu1 %v957_v62 }
  0xb0   : > { %v951_v63 = vpop.permute.xlu1 %950 }
  0xb1   : > { %v497_v1 = vpop.permute.xlu0 %496  ;;  %2128 = vrot.lane.b32.xlu1 %v4589_v46, %s4355_s21  ;;  %v956_v3 = vsel %vm270_vm1, %v951_v63, %v953_v61 }
  0xb2   : > { %v502_v4 = vsel %vm270_vm1, %v497_v1, %v499_v57  ;;  %v4768_v1 = vld [vmem:[%s4394_s17 + $0xac] ss:$12 sps:$4 sm:$0xff]  }
  0xb3   : > { %2572 = vrot.lane.b32.xlu0 %v4595_v49, %s4355_s21 }
  0xb4   : > { %v557_v5 = vpop.permute.xlu1 %556 }
  0xb5   : > { %3893 = vmatmul.mubr.msk.bf16.vlgmr.msra.gmra.mrb[0].mxu1 %vm207_vm0, %v4636_v2  ;;  %v555_v7 = vpop.permute.xlu0 %554  ;;  %2574 = vrot.lane.b32.xlu1 %v4327_v53, %s4355_s21 }
  0xb6   : > { %3871 = vmatmul.mubr.msk.bf16.vlgmr.msra.gmra.mrb[0].mxu0 %vm207_vm0, %v4636_v2  ;;  %961 = vmatpush1.bf16.msra.mxu1 %v956_v3  ;;  %v559_v8 = vsel %vm327_vm2, %v555_v7, %v557_v5 }
  0xb7   : > { %2124 = vrot.lane.b32.xlu0 %v4529_v19, %s4355_s21  ;;  %510 = vmatpush1.bf16.msra.mxu0 %v502_v4 }
  0xb8   : > { %v1008_v9 = vpop.permute.xlu1 %1007  ;;  %992 = vmatprep.mubr.bf16.mxu1 %v4353_v0  ;;  %541 = vmatprep.mubr.bf16.mxu0 %v4353_v0 }
  0xb9   : > { %v1006_v12 = vpop.permute.xlu0 %1005  ;;  %565 = vmatprep.subr.bf16.mxu0 %v559_v8  ;;  %2570 = vrot.lane.b32.xlu1 %v4615_v58, %s4355_s21 }
  0xba   : > { %v1010_v13 = vsel %vm327_vm2, %v1006_v12, %v1008_v9 }
  0xbb   : > { %2179 = vrot.lane.b32.xlu0 %v4525_v18, %s4356_s22  ;;  %1013 = vmatprep.subr.bf16.mxu1 %v1010_v13 }
  0xbc   : > { %v1004_v16 = vpop.permute.xlu1 %1003 }
  0xbd   : > { %v553_v17 = vpop.permute.xlu0 %552  ;;  %2181 = vrot.lane.b32.xlu1 %v4589_v46, %s4356_s22  ;;  %v1009_v21 = vsel %vm327_vm2, %v1004_v16, %v1006_v12  ;;  %v4725_v46 = vld [vmem:[%s5235_s1 + $0x1c] sm:$0xf] }
  0xbe   : > { %v558_v22 = vsel %vm327_vm2, %v553_v17, %v555_v7 }
  0xbf   : > { %2625 = vrot.lane.b32.xlu0 %v4595_v49, %s4356_s22 }
  0xc0   : > { %v613_v23 = vpop.permute.xlu1 %612 }
  0xc1   : > { %3895 = vmatmul.mubr.msk.bf16.vlgmr.msra.gmra.mrb[0].mxu1 %vm207_vm0, %v4662_v20  ;;  %v611_v24 = vpop.permute.xlu0 %610  ;;  %2627 = vrot.lane.b32.xlu1 %v4327_v53, %s4356_s22 }
  0xc2   : > { %3873 = vmatmul.mubr.msk.bf16.vlgmr.msra.gmra.mrb[0].mxu0 %vm207_vm0, %v4662_v20  ;;  %1014 = vmatpush1.bf16.msra.mxu1 %v1009_v21  ;;  %v615_v25 = vsel %vm384_vm3, %v611_v24, %v613_v23 }
  0xc3   : > { %2177 = vrot.lane.b32.xlu0 %v4529_v19, %s4356_s22  ;;  %566 = vmatpush1.bf16.msra.mxu0 %v558_v22 }
  0xc4   : > { %v1061_v26 = vpop.permute.xlu1 %1060  ;;  %1045 = vmatprep.mubr.bf16.mxu1 %v4353_v0  ;;  %597 = vmatprep.mubr.bf16.mxu0 %v4353_v0 }
  0xc5   : > { %v1059_v27 = vpop.permute.xlu0 %1058  ;;  %621 = vmatprep.subr.bf16.mxu0 %v615_v25  ;;  %2623 = vrot.lane.b32.xlu1 %v4615_v58, %s4356_s22  ;;  %v4797_v25 = vld [vmem:[%s4394_s17 + $0x98] ss:$12 sps:$4 sm:$0xff]  }
  0xc6   : > { %v1063_v29 = vsel %vm384_vm3, %v1059_v27, %v1061_v26 }
  0xc7   : > { %2290 = vrot.lane.b32.xlu0 %v4595_v49, %s4354_s18  ;;  %1066 = vmatprep.subr.bf16.mxu1 %v1063_v29 }
  0xc8   : > { %v1057_v32 = vpop.permute.xlu1 %1056 }
  0xc9   : > { %v609_v33 = vpop.permute.xlu0 %608  ;;  %2292 = vrot.lane.b32.xlu1 %v4681_v28, %s4354_s18  ;;  %v1062_v36 = vsel %vm384_vm3, %v1057_v32, %v1059_v27 }
  0xca   : > { %v614_v37 = vsel %vm384_vm3, %v609_v33, %v611_v24 }
  0xcb   : > { %2736 = vrot.lane.b32.xlu0 %v4687_v31, %s4354_s18 }
  0xcc   : > { %v1184_v38 = vpop.permute.xlu1 %1183 }
  0xcd   : > { %3896 = vmatmul.mubr.msk.bf16.vlgmr.msra.gmra.mrb[0].mxu1 %vm207_vm0, %v4697_v35  ;;  %v1182_v39 = vpop.permute.xlu0 %1181  ;;  %2738 = vrot.lane.b32.xlu1 %v4692_v34, %s4354_s18 }
  0xce   : > { %3874 = vmatmul.mubr.msk.bf16.vlgmr.msra.gmra.mrb[0].mxu0 %vm207_vm0, %v4697_v35  ;;  %1067 = vmatpush1.bf16.msra.mxu1 %v1062_v36  ;;  %v1186_v48 = vsel %vm270_vm1, %v1182_v39, %v1184_v38 }
  0xcf   : > { %2288 = vrot.lane.b32.xlu0 %v4615_v58, %s4354_s18  ;;  %622 = vmatpush1.bf16.msra.mxu0 %v614_v37  ;;  %v4829_v37 = vld [vmem:[%s4394_s17 + $0xa8] ss:$12 sps:$4 sm:$0xff]  }
  0xd0   : > { %1098 = vmatprep.mubr.bf16.mxu1 %v4353_v0  ;;  %653 = vmatprep.mubr.bf16.mxu0 %v4353_v0  ;;  %v1630_v40 = vpop.permute.xlu1 %1629 }
  0xd1   : > { %v1628_v43 = vpop.permute.xlu0 %1627  ;;  %1131 = vmatprep.subr.bf16.mxu0 %v4449_v10  ;;  %1577 = vmatprep.subr.bf16.mxu1 %v4487_v14 }
  0xd2   : > { %2734 = vrot.lane.b32.xlu1 %v4714_v42, %s4354_s18  ;;  %v1632_v50 = vsel %vm270_vm1, %v1628_v43, %v1630_v40 }
  0xd3   : > { %2343 = vrot.lane.b32.xlu0 %v4595_v49, %s4355_s21 }
  0xd4   : > { %v1626_v44 = vpop.permute.xlu1 %1625 }
  0xd5   : > { %v1180_v45 = vpop.permute.xlu0 %1179  ;;  %v1631_v53 = vsel %vm270_vm1, %v1626_v44, %v1628_v43 }
  0xd6   : > { %2345 = vrot.lane.b32.xlu1 %v4681_v28, %s4355_s21  ;;  %v1185_v54 = vsel %vm270_vm1, %v1180_v45, %v1182_v39 }
  0xd7   : > { %2789 = vrot.lane.b32.xlu0 %v4687_v31, %s4355_s21 }
  0xd8   : > { %v1237_v10 = vpop.permute.xlu1 %1236 }
  0xd9   : > { %3897 = vmatmul.mubr.msk.bf16.vlgmr.msra.gmra.mrb[0].mxu1 %vm207_vm0, %v4725_v46  ;;  %v1235_v47 = vpop.permute.xlu0 %1234 }
  0xda   : > { %3875 = vmatmul.mubr.msk.bf16.vlgmr.msra.gmra.mrb[0].mxu0 %vm207_vm0, %v4725_v46  ;;  %1578 = vmatpush1.bf16.msra.mxu1 %v4491_v15  ;;  %v1239_v57 = vsel %vm327_vm2, %v1235_v47, %v1237_v10 }
  0xdb   : > { %2341 = vrot.lane.b32.xlu0 %v4615_v58, %s4355_s21  ;;  %1132 = vmatpush1.bf16.msra.mxu0 %v4453_v11 }
  0xdc   : > { %1609 = vmatprep.mubr.bf16.mxu1 %v4353_v0  ;;  %1163 = vmatprep.mubr.bf16.mxu0 %v4353_v0  ;;  %v1683_v51 = vpop.permute.xlu1 %1682 }
  0xdd   : > { %1189 = vmatprep.subr.bf16.mxu0 %v1186_v48  ;;  %1635 = vmatprep.subr.bf16.mxu1 %v1632_v50  ;;  %v1681_v52 = vpop.permute.xlu0 %1680 }
  0xde   : > { %2791 = vrot.lane.b32.xlu1 %v4692_v34, %s4355_s21  ;;  %v1685_v59 = vsel %vm327_vm2, %v1681_v52, %v1683_v51 }
  0xdf   : > { %2396 = vrot.lane.b32.xlu0 %v4595_v49, %s4356_s22 }
  0xe0   : > { %v1679_v56 = vpop.permute.xlu1 %1678 }
  0xe1   : > { %3934 = vmatmul.mubr.msk.bf16.vlgmr.msra.gmra.mrb[4].mxu1 %vm207_vm0, %v4412_v6  ;;  %v1233_v11 = vpop.permute.xlu0 %1232  ;;  %v1684_v3 = vsel %vm327_vm2, %v1679_v56, %v1681_v52 }
  0xe2   : > { %3910 = vmatmul.mubr.msk.bf16.vlgmr.msra.gmra.mrb[4].mxu0 %vm207_vm0, %v4412_v6  ;;  %1636 = vmatpush1.bf16.msra.mxu1 %v1631_v53  ;;  %v1238_v4 = vsel %vm327_vm2, %v1233_v11, %v1235_v47 }
  0xe3   : > { %2842 = vrot.lane.b32.xlu0 %v4687_v31, %s4356_s22  ;;  %1190 = vmatpush1.bf16.msra.mxu0 %v1185_v54 }
  0xe4   : > { %1667 = vmatprep.mubr.bf16.mxu1 %v4353_v0  ;;  %1221 = vmatprep.mubr.bf16.mxu0 %v4353_v0  ;;  %v1290_v60 = vpop.permute.xlu1 %1289 }
  0xe5   : > { %1242 = vmatprep.subr.bf16.mxu0 %v1239_v57  ;;  %v1288_v61 = vpop.permute.xlu0 %1287  ;;  %1688 = vmatprep.subr.bf16.mxu1 %v1685_v59 }
  0xe6   : > { %2787 = vrot.lane.b32.xlu1 %v4714_v42, %s4355_s21  ;;  %v1292_v8 = vsel %vm384_vm3, %v1288_v61, %v1290_v60 }
  0xe7   : > { %2394 = vrot.lane.b32.xlu0 %v4615_v58, %s4356_s22 }
  0xe8   : > { %v1736_v62 = vpop.permute.xlu1 %1735 }
  0xe9   : > { %v1734_v63 = vpop.permute.xlu0 %1733 }
  0xea   : > { %2398 = vrot.lane.b32.xlu1 %v4681_v28, %s4356_s22  ;;  %v1738_v9 = vsel %vm384_vm3, %v1734_v63, %v1736_v62  ;;  %v4808_v28 = vld [vmem:[%s4394_s17 + $0xb0] ss:$12 sps:$4 sm:$0xff]  }
  0xeb   : > { %2965 = vrot.lane.b32.xlu0 %v4687_v31, %s4354_s18 }
  0xec   : > { %v1732_v5 = vpop.permute.xlu1 %1731 }
  0xed   : > { %3936 = vmatmul.mubr.msk.bf16.vlgmr.msra.gmra.mrb[4].mxu1 %vm207_vm0, %v4547_v30  ;;  %v1286_v7 = vpop.permute.xlu0 %1285  ;;  %v1737_v21 = vsel %vm384_vm3, %v1732_v5, %v1734_v63 }
  0xee   : > { %3912 = vmatmul.mubr.msk.bf16.vlgmr.msra.gmra.mrb[4].mxu0 %vm207_vm0, %v4547_v30  ;;  %1689 = vmatpush1.bf16.msra.mxu1 %v1684_v3  ;;  %v1291_v22 = vsel %vm384_vm3, %v1286_v7, %v1288_v61 }
  0xef   : > { %3411 = vrot.lane.b32.xlu0 %v4768_v1, %s4354_s18  ;;  %1243 = vmatpush1.bf16.msra.mxu0 %v1238_v4 }
  0xf0   : > { %1720 = vmatprep.mubr.bf16.mxu1 %v4353_v0  ;;  %1274 = vmatprep.mubr.bf16.mxu0 %v4353_v0  ;;  %v1401_v12 = vpop.permute.xlu1 %1400 }
  0xf1   : > { %1295 = vmatprep.subr.bf16.mxu0 %v1292_v8  ;;  %1741 = vmatprep.subr.bf16.mxu1 %v1738_v9  ;;  %v1399_v13 = vpop.permute.xlu0 %1398 }
  0xf2   : > { %2844 = vrot.lane.b32.xlu1 %v4692_v34, %s4356_s22  ;;  %v1403_v33 = vsel %vm270_vm1, %v1399_v13, %v1401_v12 }
  0xf3   : > { %2963 = vrot.lane.b32.xlu0 %v4714_v42, %s4354_s18 }
  0xf4   : > { %v1847_v16 = vpop.permute.xlu1 %1846 }
  0xf5   : > { %v1845_v17 = vpop.permute.xlu0 %1844 }
  0xf6   : > { %2840 = vrot.lane.b32.xlu1 %v4714_v42, %s4356_s22  ;;  %v1849_v34 = vsel %vm270_vm1, %v1845_v17, %v1847_v16  ;;  %v187_v16 = vld [vmem:[%s5236_s2] sm:$0xff] }
  0xf7   : > { %3018 = vrot.lane.b32.xlu0 %v4687_v31, %s4355_s21 }
  0xf8   : > { %v1843_v23 = vpop.permute.xlu1 %1842 }
  0xf9   : > { %3937 = vmatmul.mubr.msk.bf16.vlgmr.msra.gmra.mrb[4].mxu1 %vm207_vm0, %v4572_v41  ;;  %v1397_v24 = vpop.permute.xlu0 %1396  ;;  %v1848_v44 = vsel %vm270_vm1, %v1843_v23, %v1845_v17  ;;  %v4342_v23 = vld [vmem:[%s4394_s17 + $0xc8] ss:$12 sps:$4 sm:$0xff]  }
  0xfa   : > { %3913 = vmatmul.mubr.msk.bf16.vlgmr.msra.gmra.mrb[4].mxu0 %vm207_vm0, %v4572_v41  ;;  %1742 = vmatpush1.bf16.msra.mxu1 %v1737_v21  ;;  %v1402_v45 = vsel %vm270_vm1, %v1397_v24, %v1399_v13  ;;  %v4341_v13 = vld [vmem:[%s4394_s17 + $0xb0] ss:$12 sps:$4 sm:$0xff]  }
  0xfb   : > { %3464 = vrot.lane.b32.xlu0 %v4768_v1, %s4355_s21  ;;  %1296 = vmatpush1.bf16.msra.mxu0 %v1291_v22 }
  0xfc   : > { %1327 = vmatprep.mubr.bf16.mxu0 %v4353_v0  ;;  %1773 = vmatprep.mubr.bf16.mxu1 %v4353_v0  ;;  %v1454_v26 = vpop.permute.xlu1 %1453 }
  0xfd   : > { %v1452_v27 = vpop.permute.xlu0 %1451  ;;  %1794 = vmatprep.subr.bf16.mxu1 %v4525_v18  ;;  %1348 = vmatprep.subr.bf16.mxu0 %v4487_v14 }
  0xfe   : > { %2967 = vrot.lane.b32.xlu1 %v4797_v25, %s4354_s18  ;;  %v1456_v47 = vsel %vm327_vm2, %v1452_v27, %v1454_v26 }
  0xff   : > { %3016 = vrot.lane.b32.xlu0 %v4714_v42, %s4355_s21 }
 0x100   : > { %v1900_v29 = vpop.permute.xlu1 %1899 }
 0x101   : > { %v1898_v32 = vpop.permute.xlu0 %1897 }
 0x102   : > { %3413 = vrot.lane.b32.xlu1 %v4808_v28, %s4354_s18  ;;  %v1902_v48 = vsel %vm327_vm2, %v1898_v32, %v1900_v29 }
 0x103   : > { %3071 = vrot.lane.b32.xlu0 %v4687_v31, %s4356_s22 }
 0x105   : > { %3938 = vmatmul.mubr.msk.bf16.vlgmr.msra.gmra.mrb[4].mxu1 %vm207_vm0, %v4605_v55  ;;  %v1450_v14 = vpop.permute.xlu0 %1449 }
 0x106   : > { %3914 = vmatmul.mubr.msk.bf16.vlgmr.msra.gmra.mrb[4].mxu0 %vm207_vm0, %v4605_v55  ;;  %1795 = vmatpush1.bf16.msra.mxu1 %v4529_v19  ;;  %v1896_v36 = vpop.permute.xlu1 %1895  ;;  %v1455_v11 = vsel %vm327_vm2, %v1450_v14, %v1452_v27  ;;  %v4930_v27 = vld [vmem:[%s4394_s17 + $0xc0] ss:$12 sps:$4 sm:$0xff]  }
 0x107   : > { %3517 = vrot.lane.b32.xlu0 %v4768_v1, %s4356_s22  ;;  %1349 = vmatpush1.bf16.msra.mxu0 %v4491_v15  ;;  %v4840_v15 = vld [vmem:[%s4394_s17 + $0xc4] ss:$12 sps:$4 sm:$0xff]   ;;  %v1901_v54 = vsel %vm327_vm2, %v1896_v36, %v1898_v32 }
 0x108   : > { %1380 = vmatprep.mubr.bf16.mxu0 %v4353_v0  ;;  %1826 = vmatprep.mubr.bf16.mxu1 %v4353_v0 }
 0x109   : > { %1406 = vmatprep.subr.bf16.mxu0 %v1403_v33  ;;  %1852 = vmatprep.subr.bf16.mxu1 %v1849_v34  ;;  %v1505_v38 = vpop.permute.xlu0 %1504 }
 0x10a   : > { %v1507_v39 = vpop.permute.xlu1 %1506  ;;  %3409 = vrot.lane.b32.xlu1 %v4829_v37, %s4354_s18 }
 0x10b   : > { %3069 = vrot.lane.b32.xlu0 %v4714_v42, %s4356_s22  ;;  %v1509_v59 = vsel %vm384_vm3, %v1505_v38, %v1507_v39 }
 0x10d   : > { %v1951_v40 = vpop.permute.xlu0 %1950 }
 0x10e   : > { %v1953_v43 = vpop.permute.xlu1 %1952  ;;  %3020 = vrot.lane.b32.xlu1 %v4797_v25, %s4355_s21 }
 0x10f   : > { %3182 = vrot.lane.b32.xlu0 %v4768_v1, %s4354_s18  ;;  %v1955_v60 = vsel %vm384_vm3, %v1951_v40, %v1953_v43 }
 0x111   : > { %3941 = vmatmul.mubr.msk.bf16.vlgmr.msra.gmra.mrb[4].mxu1 %vm207_vm0, %v4636_v2  ;;  %v1503_v10 = vpop.permute.xlu0 %1502 }
 0x112   : > { %3917 = vmatmul.mubr.msk.bf16.vlgmr.msra.gmra.mrb[4].mxu0 %vm207_vm0, %v4636_v2  ;;  %1853 = vmatpush1.bf16.msra.mxu1 %v1848_v44  ;;  %v1949_v50 = vpop.permute.xlu1 %1948  ;;  %v1508_v7 = vsel %vm384_vm3, %v1503_v10, %v1505_v38 }
 0x113   : > { %3628 = vrot.lane.b32.xlu0 %v4840_v15, %s4354_s18  ;;  %1407 = vmatpush1.bf16.msra.mxu0 %v1402_v45  ;;  %v1954_v4 = vsel %vm384_vm3, %v1949_v50, %v1951_v40 }
 0x114   : > { %1438 = vmatprep.mubr.bf16.mxu0 %v4353_v0  ;;  %1884 = vmatprep.mubr.bf16.mxu1 %v4353_v0 }
 0x115   : > { %1459 = vmatprep.subr.bf16.mxu0 %v1456_v47  ;;  %1905 = vmatprep.subr.bf16.mxu1 %v1902_v48  ;;  %v4854_v51 = vpop.permute.xlu0 %2073 }
 0x116   : > { %3466 = vrot.lane.b32.xlu1 %v4808_v28, %s4355_s21  ;;  %v2076_v52 = vpop.permute.xlu1 %2075 }
 0x117   : > { %3180 = vrot.lane.b32.xlu0 %v4829_v37, %s4354_s18 }
 0x119   : > { %v4860_v53 = vpop.permute.xlu0 %2519 }
 0x11a   : > { %3462 = vrot.lane.b32.xlu1 %v4829_v37, %s4355_s21 }
 0x11b   : > { %3235 = vrot.lane.b32.xlu0 %v4768_v1, %s4355_s21  ;;  %v2522_v56 = vpop.permute.xlu1 %2521 }
 0x11c   : > { %v2524_v24 = vsel %vm270_vm1, %v4860_v53, %v2522_v56 }
 0x11d   : > { %3943 = vmatmul.mubr.msk.bf16.vlgmr.msra.gmra.mrb[4].mxu1 %vm207_vm0, %v4662_v20  ;;  %v2072_v57 = vpop.permute.xlu0 %2071 }
 0x11e   : > { %3919 = vmatmul.mubr.msk.bf16.vlgmr.msra.gmra.mrb[4].mxu0 %vm207_vm0, %v4662_v20  ;;  %1906 = vmatpush1.bf16.msra.mxu1 %v1901_v54  ;;  %v2077_v29 = vsel %vm270_vm1, %v2072_v57, %v4854_v51 }
 0x11f   : > { %3681 = vrot.lane.b32.xlu0 %v4840_v15, %s4355_s21  ;;  %1460 = vmatpush1.bf16.msra.mxu0 %v1455_v11  ;;  %v2518_v61 = vpop.permute.xlu1 %2517 }
 0x120   : > { %1491 = vmatprep.mubr.bf16.mxu0 %v4353_v0  ;;  %1937 = vmatprep.mubr.bf16.mxu1 %v4353_v0 }
 0x121   : > { %1512 = vmatprep.subr.bf16.mxu0 %v1509_v59  ;;  %1958 = vmatprep.subr.bf16.mxu1 %v1955_v60  ;;  %v4878_v62 = vpop.permute.xlu0 %2126 }
 0x122   : > { %3073 = vrot.lane.b32.xlu1 %v4797_v25, %s4356_s22 }
 0x123   : > { %3233 = vrot.lane.b32.xlu0 %v4829_v37, %s4355_s21  ;;  %v2129_v63 = vpop.permute.xlu1 %2128 }
 0x124   : > { %v2131_v32 = vsel %vm327_vm2, %v4878_v62, %v2129_v63 }
 0x125   : > { %v4884_v3 = vpop.permute.xlu0 %2572 }
 0x126   : > { %3519 = vrot.lane.b32.xlu1 %v4808_v28, %s4356_s22  ;;  %v2523_v28 = vsel %vm270_vm1, %v2518_v61, %v4860_v53 }
 0x127   : > { %3288 = vrot.lane.b32.xlu0 %v4768_v1, %s4356_s22  ;;  %v2575_v5 = vpop.permute.xlu1 %2574 }
 0x128   : > { %v2577_v14 = vsel %vm327_vm2, %v4884_v3, %v2575_v5 }
 0x129   : > { %3944 = vmatmul.mubr.msk.bf16.vlgmr.msra.gmra.mrb[4].mxu1 %vm207_vm0, %v4697_v35  ;;  %v2125_v8 = vpop.permute.xlu0 %2124 }
 0x12a   : > { %3920 = vmatmul.mubr.msk.bf16.vlgmr.msra.gmra.mrb[4].mxu0 %vm207_vm0, %v4697_v35  ;;  %1959 = vmatpush1.bf16.msra.mxu1 %v1954_v4  ;;  %v2130_v39 = vsel %vm327_vm2, %v2125_v8, %v4878_v62 }
 0x12b   : > { %3734 = vrot.lane.b32.xlu0 %v4840_v15, %s4356_s22  ;;  %1513 = vmatpush1.bf16.msra.mxu0 %v1508_v7  ;;  %v2571_v12 = vpop.permute.xlu1 %2570 }
 0x12c   : > { %1544 = vmatprep.mubr.bf16.mxu0 %v4353_v0  ;;  %1990 = vmatprep.mubr.bf16.mxu1 %v4353_v0 }
 0x12d   : > { %2469 = vmatprep.subr.bf16.mxu1 %v4595_v49  ;;  %v4901_v9 = vpop.permute.xlu0 %2179  ;;  %2023 = vmatprep.subr.bf16.mxu0 %v4525_v18  ;;  %v2078_v18 = vsel %vm270_vm1, %v4854_v51, %v2076_v52 }
 0x12e   : > { %3515 = vrot.lane.b32.xlu1 %v4829_v37, %s4356_s22 }
 0x12f   : > { %3286 = vrot.lane.b32.xlu0 %v4829_v37, %s4356_s22  ;;  %v2182_v21 = vpop.permute.xlu1 %2181 }
 0x130   : > { %v2184_v43 = vsel %vm384_vm3, %v4901_v9, %v2182_v21 }
 0x131   : > { %v2626_v17 = vpop.permute.xlu0 %2625 }
 0x132   : > { %3184 = vrot.lane.b32.xlu1 %v4341_v13, %s4354_s18 }
 0x133   : > { %254 = vperm.xlu0 %4300, %v187_v16   ;;  %v2628_v26 = vpop.permute.xlu1 %2627 }
 0x134   : > { %v2630_v45 = vsel %vm384_vm3, %v2626_v17, %v2628_v26 }
 0x135   : > { %3945 = vmatmul.mubr.msk.bf16.vlgmr.msra.gmra.mrb[4].mxu1 %vm207_vm0, %v4725_v46  ;;  %v2178_v22 = vpop.permute.xlu0 %2177 }
 0x136   : > { %3921 = vmatmul.mubr.msk.bf16.vlgmr.msra.gmra.mrb[4].mxu0 %vm207_vm0, %v4725_v46  ;;  %2470 = vmatpush1.bf16.msra.mxu1 %v4615_v58  ;;  %v2183_v51 = vsel %vm384_vm3, %v2178_v22, %v4901_v9 }
 0x137   : > { %2024 = vmatpush1.bf16.msra.mxu0 %v4529_v19  ;;  %2055 = vmatprep.mubr.bf16.mxu0 %v4353_v0  ;;  %v2624_v33 = vpop.permute.xlu1 %2623 }
 0x138   : > { %2501 = vmatprep.mubr.bf16.mxu1 %v4353_v0  ;;  %2081 = vmatprep.subr.bf16.mxu0 %v2078_v18  ;;  %v2629_v50 = vsel %vm384_vm3, %v2624_v33, %v2626_v17 }
 0x139   : > { %2527 = vmatprep.subr.bf16.mxu1 %v2524_v24  ;;  %v4926_v25 = vpop.permute.xlu0 %2290  ;;  %3630 = vrot.lane.b32.xlu1 %v4342_v23, %s4354_s18 }
 0x13b   : > { %v2293_v36 = vpop.permute.xlu1 %2292 }
 0x13c   : > { %v2295_v59 = vsel %vm270_vm1, %v4926_v25, %v2293_v36 }
 0x13d   : > { %3982 = vmatmul.mubr.msk.bf16.vlgmr.msra.gmra.mrb[8].mxu1 %vm207_vm0, %v4412_v6  ;;  %v4938_v19 = vpop.permute.xlu0 %2736  ;;  %3626 = vrot.lane.b32.xlu1 %v4930_v27, %s4354_s18 }
 0x13e   : > { %3958 = vmatmul.mubr.msk.bf16.vlgmr.msra.gmra.mrb[8].mxu0 %vm207_vm0, %v4412_v6  ;;  %2528 = vmatpush1.bf16.msra.mxu1 %v2523_v28  ;;  %v2576_v6 = vsel %vm327_vm2, %v2571_v12, %v4884_v3 }
 0x13f   : > { %2082 = vmatpush1.bf16.msra.mxu0 %v2077_v29  ;;  %2113 = vmatprep.mubr.bf16.mxu0 %v4353_v0  ;;  %v2739_v44 = vpop.permute.xlu1 %2738 }
 0x140   : > { %2559 = vmatprep.mubr.bf16.mxu1 %v4353_v0  ;;  %2134 = vmatprep.subr.bf16.mxu0 %v2131_v32 }
 0x141   : > { %2580 = vmatprep.subr.bf16.mxu1 %v2577_v14  ;;  %v2289_v34 = vpop.permute.xlu0 %2288  ;;  %3237 = vrot.lane.b32.xlu1 %v4341_v13, %s4355_s21 }
 0x142   : > { %v2294_v4 = vsel %vm270_vm1, %v2289_v34, %v4926_v25 }
 0x144   : > { %v2735_v47 = vpop.permute.xlu1 %2734 }
 0x145   : > { %v4951_v38 = vpop.permute.xlu0 %2343  ;;  %3683 = vrot.lane.b32.xlu1 %v4342_v23, %s4355_s21  ;;  %v2740_v3 = vsel %vm270_vm1, %v2735_v47, %v4938_v19 }
 0x148   : > { %v2346_v53 = vpop.permute.xlu1 %2345 }
 0x149   : > { %3984 = vmatmul.mubr.msk.bf16.vlgmr.msra.gmra.mrb[8].mxu1 %vm207_vm0, %v4547_v30  ;;  %v4960_v40 = vpop.permute.xlu0 %2789  ;;  %3679 = vrot.lane.b32.xlu1 %v4930_v27, %s4355_s21  ;;  %v2348_v5 = vsel %vm327_vm2, %v4951_v38, %v2346_v53 }
 0x14a   : > { %3960 = vmatmul.mubr.msk.bf16.vlgmr.msra.gmra.mrb[8].mxu0 %vm207_vm0, %v4547_v30  ;;  %2581 = vmatpush1.bf16.msra.mxu1 %v2576_v6 }
 0x14b   : > { %2135 = vmatpush1.bf16.msra.mxu0 %v2130_v39  ;;  %2166 = vmatprep.mubr.bf16.mxu0 %v4353_v0 }
 0x14c   : > { %2612 = vmatprep.mubr.bf16.mxu1 %v4353_v0  ;;  %2187 = vmatprep.subr.bf16.mxu0 %v2184_v43 }
 0x14d   : > { %2633 = vmatprep.subr.bf16.mxu1 %v2630_v45  ;;  %v2342_v10 = vpop.permute.xlu0 %2341  ;;  %3290 = vrot.lane.b32.xlu1 %v4341_v13, %s4356_s22 }
 0x14e   : > { %v2347_v21 = vsel %vm327_vm2, %v2342_v10, %v4951_v38 }
 0x150   : > { %v2792_v56 = vpop.permute.xlu1 %2791 }
 0x151   : > { %v4972_v48 = vpop.permute.xlu0 %2396  ;;  %3736 = vrot.lane.b32.xlu1 %v4342_v23, %s4356_s22  ;;  %v2794_v8 = vsel %vm327_vm2, %v4960_v40, %v2792_v56 }
 0x155   : > { %3985 = vmatmul.mubr.msk.bf16.vlgmr.msra.gmra.mrb[8].mxu1 %vm207_vm0, %v4572_v41  ;;  %v4980_v52 = vpop.permute.xlu0 %2842  ;;  %3732 = vrot.lane.b32.xlu1 %v4930_v27, %s4356_s22 }
 0x156   : > { %3961 = vmatmul.mubr.msk.bf16.vlgmr.msra.gmra.mrb[8].mxu0 %vm207_vm0, %v4572_v41  ;;  %2634 = vmatpush1.bf16.msra.mxu1 %v2629_v50 }
 0x157   : > { %2188 = vmatpush1.bf16.msra.mxu0 %v2183_v51  ;;  %2219 = vmatprep.mubr.bf16.mxu0 %v4353_v0 }
 0x158   : > { %2665 = vmatprep.mubr.bf16.mxu1 %v4353_v0  ;;  %2686 = vmatprep.subr.bf16.mxu1 %v4687_v31  ;;  %v2788_v60 = vpop.permute.xlu1 %2787 }
 0x159   : > { %v2395_v54 = vpop.permute.xlu0 %2394  ;;  %2240 = vmatprep.subr.bf16.mxu0 %v4595_v49  ;;  %v2741_v49 = vsel %vm270_vm1, %v4938_v19, %v2739_v44  ;;  %v2793_v16 = vsel %vm327_vm2, %v2788_v60, %v4960_v40 }
 0x15a   : > { %v2400_v19 = vsel %vm384_vm3, %v2395_v54, %v4972_v48 }
 0x15c   : > { %v2399_v62 = vpop.permute.xlu1 %2398 }
 0x15d   : > { %v4990_v11 = vpop.permute.xlu0 %2965  ;;  %v2401_v22 = vsel %vm384_vm3, %v4972_v48, %v2399_v62 }
 0x161   : > { %3986 = vmatmul.mubr.msk.bf16.vlgmr.msra.gmra.mrb[8].mxu1 %vm207_vm0, %v4605_v55  ;;  %v4994_v57 = vpop.permute.xlu0 %3411 }
 0x162   : > { %3962 = vmatmul.mubr.msk.bf16.vlgmr.msra.gmra.mrb[8].mxu0 %vm207_vm0, %v4605_v55  ;;  %2687 = vmatpush1.bf16.msra.mxu1 %v4714_v42 }
 0x163   : > { %2241 = vmatpush1.bf16.msra.mxu0 %v4615_v58  ;;  %2272 = vmatprep.mubr.bf16.mxu0 %v4353_v0 }
 0x164   : > { %2718 = vmatprep.mubr.bf16.mxu1 %v4353_v0  ;;  %2298 = vmatprep.subr.bf16.mxu0 %v2295_v59  ;;  %v2845_v7 = vpop.permute.xlu1 %2844 }
 0x165   : > { %2744 = vmatprep.subr.bf16.mxu1 %v2741_v49  ;;  %v5006_v61 = vpop.permute.xlu0 %2963  ;;  %v2847_v23 = vsel %vm384_vm3, %v4980_v52, %v2845_v7 }
 0x166   : > { %v2969_v43 = vsel %vm270_vm1, %v5006_v61, %v4990_v11 }
 0x168   : > { %v2841_v12 = vpop.permute.xlu1 %2840 }
 0x169   : > { %v5008_v63 = vpop.permute.xlu0 %3018  ;;  %v2846_v28 = vsel %vm384_vm3, %v2841_v12, %v4980_v52 }
 0x16d   : > { %3989 = vmatmul.mubr.msk.bf16.vlgmr.msra.gmra.mrb[8].mxu1 %vm207_vm0, %v4636_v2  ;;  %v5016_v58 = vpop.permute.xlu0 %3464 }
 0x16e   : > { %3965 = vmatmul.mubr.msk.bf16.vlgmr.msra.gmra.mrb[8].mxu0 %vm207_vm0, %v4636_v2  ;;  %2745 = vmatpush1.bf16.msra.mxu1 %v2740_v3 }
 0x16f   : > { %2299 = vmatpush1.bf16.msra.mxu0 %v2294_v4  ;;  %2330 = vmatprep.mubr.bf16.mxu0 %v4353_v0 }
 0x170   : > { %2776 = vmatprep.mubr.bf16.mxu1 %v4353_v0  ;;  %2351 = vmatprep.subr.bf16.mxu0 %v2348_v5  ;;  %v2968_v17 = vpop.permute.xlu1 %2967 }
 0x171   : > { %2797 = vmatprep.subr.bf16.mxu1 %v2794_v8  ;;  %v5026_v9 = vpop.permute.xlu0 %3016  ;;  %v2970_v38 = vsel %vm270_vm1, %v4990_v11, %v2968_v17 }
 0x172   : > { %v3022_v52 = vsel %vm327_vm2, %v5026_v9, %v5008_v63 }
 0x174   : > { %v3414_v25 = vpop.permute.xlu1 %3413 }
 0x175   : > { %v5028_v13 = vpop.permute.xlu0 %3071  ;;  %v3416_v6 = vsel %vm270_vm1, %v4994_v57, %v3414_v25 }
 0x179   : > { %3991 = vmatmul.mubr.msk.bf16.vlgmr.msra.gmra.mrb[8].mxu1 %vm207_vm0, %v4662_v20  ;;  %v5036_v18 = vpop.permute.xlu0 %3517 }
 0x17a   : > { %3967 = vmatmul.mubr.msk.bf16.vlgmr.msra.gmra.mrb[8].mxu0 %vm207_vm0, %v4662_v20  ;;  %2798 = vmatpush1.bf16.msra.mxu1 %v2793_v16 }
 0x17b   : > { %2352 = vmatpush1.bf16.msra.mxu0 %v2347_v21  ;;  %2383 = vmatprep.mubr.bf16.mxu0 %v4353_v0 }
 0x17c   : > { %2829 = vmatprep.mubr.bf16.mxu1 %v4353_v0  ;;  %2404 = vmatprep.subr.bf16.mxu0 %v2401_v22  ;;  %v3410_v29 = vpop.permute.xlu1 %3409 }
 0x17d   : > { %2850 = vmatprep.subr.bf16.mxu1 %v2847_v23  ;;  %v5046_v24 = vpop.permute.xlu0 %3069  ;;  %v3415_v40 = vsel %vm270_vm1, %v3410_v29, %v4994_v57 }
 0x180   : > { %v3021_v33 = vpop.permute.xlu1 %3020 }
 0x181   : > { %v5048_v26 = vpop.permute.xlu0 %3182  ;;  %v3023_v44 = vsel %vm327_vm2, %v5008_v63, %v3021_v33 }
 0x185   : > { %3992 = vmatmul.mubr.msk.bf16.vlgmr.msra.gmra.mrb[8].mxu1 %vm207_vm0, %v4697_v35  ;;  %v5056_v32 = vpop.permute.xlu0 %3628 }
 0x186   : > { %3968 = vmatmul.mubr.msk.bf16.vlgmr.msra.gmra.mrb[8].mxu0 %vm207_vm0, %v4697_v35  ;;  %2851 = vmatpush1.bf16.msra.mxu1 %v2846_v28 }
 0x187   : > { %2405 = vmatpush1.bf16.msra.mxu0 %v2400_v19  ;;  %2436 = vmatprep.mubr.bf16.mxu0 %v4353_v0 }
 0x188   : > { %2882 = vmatprep.mubr.bf16.mxu1 %v4353_v0  ;;  %3361 = vmatprep.subr.bf16.mxu1 %v4768_v1  ;;  %v3467_v36 = vpop.permute.xlu1 %3466 }
 0x189   : > { %v5063_v14 = vpop.permute.xlu0 %3180  ;;  %2915 = vmatprep.subr.bf16.mxu0 %v4687_v31  ;;  %v3469_v10 = vsel %vm327_vm2, %v5016_v58, %v3467_v36 }
 0x18c   : > { %v3463_v39 = vpop.permute.xlu1 %3462 }
 0x18d   : > { %v5066_v34 = vpop.permute.xlu0 %3235  ;;  %v3468_v51 = vsel %vm327_vm2, %v3463_v39, %v5016_v58  ;;  %v3075_v58 = vsel %vm384_vm3, %v5046_v24, %v5028_v13 }
 0x191   : > { %3993 = vmatmul.mubr.msk.bf16.vlgmr.msra.gmra.mrb[8].mxu1 %vm207_vm0, %v4725_v46  ;;  %v5080_v31 = vpop.permute.xlu0 %3681 }
 0x192   : > { %3969 = vmatmul.mubr.msk.bf16.vlgmr.msra.gmra.mrb[8].mxu0 %vm207_vm0, %v4725_v46  ;;  %3362 = vmatpush1.bf16.msra.mxu1 %v4829_v37 }
 0x193   : > { %2916 = vmatpush1.bf16.msra.mxu0 %v4714_v42  ;;  %2947 = vmatprep.mubr.bf16.mxu0 %v4353_v0  ;;  %v4344_v42 = vld [vmem:[%s5235_s1] sm:$0xf] }
 0x194   : > { %3393 = vmatprep.mubr.bf16.mxu1 %v4353_v0  ;;  %2973 = vmatprep.subr.bf16.mxu0 %v2970_v38  ;;  %v3074_v47 = vpop.permute.xlu1 %3073 }
 0x195   : > { %3419 = vmatprep.subr.bf16.mxu1 %v3416_v6  ;;  %v5094_v45 = vpop.permute.xlu0 %3233  ;;  %v3076_v53 = vsel %vm384_vm3, %v5028_v13, %v3074_v47 }
 0x196   : > { %v3239_v25 = vsel %vm327_vm2, %v5094_v45, %v5066_v34 }
 0x198   : > { %v3520_v50 = vpop.permute.xlu1 %3519 }
 0x199   : > { %4030 = vmatmul.mubr.msk.bf16.vlgmr.msra.gmra.mrb[12].mxu1 %vm207_vm0, %v4344_v42  ;;  %v5100_v48 = vpop.permute.xlu0 %3288  ;;  %v3522_v56 = vsel %vm384_vm3, %v5036_v18, %v3520_v50 }
 0x19a   : > { %4006 = vmatmul.mubr.msk.bf16.vlgmr.msra.gmra.mrb[12].mxu0 %vm207_vm0, %v4344_v42  ;;  %3420 = vmatpush1.bf16.msra.mxu1 %v3415_v40 }
 0x19b   : > { %2974 = vmatpush1.bf16.msra.mxu0 %v2969_v43  ;;  %3005 = vmatprep.mubr.bf16.mxu0 %v4353_v0 }
 0x19c   : > { %3451 = vmatprep.mubr.bf16.mxu1 %v4353_v0  ;;  %3026 = vmatprep.subr.bf16.mxu0 %v3023_v44 }
 0x19d   : > { %3472 = vmatprep.subr.bf16.mxu1 %v3469_v10  ;;  %v5113_v54 = vpop.permute.xlu0 %3734 }
 0x1a0   : > { %v3516_v11 = vpop.permute.xlu1 %3515 }
 0x1a1   : > { %v5119_v60 = vpop.permute.xlu0 %3286  ;;  %v3521_v4 = vsel %vm384_vm3, %v3516_v11, %v5036_v18 }
 0x1a4   : > { %v3185_v57 = vpop.permute.xlu1 %3184 }
 0x1a5   : > { %4032 = vmatmul.mubr.msk.bf16.vlgmr.msra.gmra.mrb[12].mxu1 %vm207_vm0, %v4547_v30  ;;  %v3187_v17 = vsel %vm270_vm1, %v5048_v26, %v3185_v57 }
 0x1a6   : > { %4008 = vmatmul.mubr.msk.bf16.vlgmr.msra.gmra.mrb[12].mxu0 %vm207_vm0, %v4547_v30  ;;  %3473 = vmatpush1.bf16.msra.mxu1 %v3468_v51 }
 0x1a7   : > { %3027 = vmatpush1.bf16.msra.mxu0 %v3022_v52  ;;  %3058 = vmatprep.mubr.bf16.mxu0 %v4353_v0 }
 0x1a8   : > { %3504 = vmatprep.mubr.bf16.mxu1 %v4353_v0  ;;  %3079 = vmatprep.subr.bf16.mxu0 %v3076_v53 }
 0x1a9   : > { %3525 = vmatprep.subr.bf16.mxu1 %v3522_v56 }
 0x1ab   : > { %v3631_v7 = vpop.permute.xlu1 %3630 }
 0x1ac   : > { %v1100_v59 = vpop.f32.mrb[0].mxu1  ;;  %v3633_v18 = vsel %vm270_vm1, %v5056_v32, %v3631_v7 }
 0x1ad   : > { %v655_v30 = vpop.f32.mrb[0].mxu0  ;;  %v1102_v49 = vpop.f32.mrb[1].mxu1 }
 0x1ae   : > { %v657_v61 = vpop.f32.mrb[1].mxu0  ;;  %v1104_v62 = vpop.f32.mrb[2].mxu1 }
 0x1af   : > { %v659_v63 = vpop.f32.mrb[2].mxu0  ;;  %v1105_v3 = vpop.f32.mrb[3].mxu1 }
 0x1b0   : > { %v660_v5 = vpop.f32.mrb[3].mxu0 }
 0x1b1   : > { %4033 = vmatmul.mubr.msk.bf16.vlgmr.msra.gmra.mrb[12].mxu1 %vm207_vm0, %v4572_v41 }
 0x1b2   : > { %v5134_v8 = vpop.permute.xlu0 %254  ;;  %4009 = vmatmul.mubr.msk.bf16.vlgmr.msra.gmra.mrb[12].mxu0 %vm207_vm0, %v4572_v41  ;;  %3526 = vmatpush1.bf16.msra.mxu1 %v3521_v4  ;;  %v3627_v41 = vpop.permute.xlu1 %3626 }
 0x1b3   : > { %v4047_v9 = vadd.f32 %v655_v30, %v5134_v8  ;;  %v4048_v12 = vadd.f32 %v657_v61, %v5134_v8  ;;  %v4049_v13 = vadd.f32 %v1100_v59, %v5134_v8  ;;  %v4050_v16 = vadd.f32 %v1102_v49, %v5134_v8  ;;  %3080 = vmatpush1.bf16.msra.mxu0 %v3075_v58 }
 0x1b4   : > { %3111 = vmatprep.mubr.bf16.mxu0 %v4353_v0  ;;  %3557 = vmatprep.mubr.bf16.mxu1 %v4353_v0 }
 0x1b5   : > { %664 = vst [vmem:[%s5132_s19] sm:$0xff] %v4047_v9  ;;  %665 = vst [vmem:[%s5132_s19 + $0x8] sm:$0xff] %v4048_v12  ;;  %3132 = vmatprep.subr.bf16.mxu0 %v4768_v1  ;;  %3578 = vmatprep.subr.bf16.mxu1 %v4840_v15  ;;  %v3632_v15 = vsel %vm270_vm1, %v3627_v41, %v5056_v32  ;;  %v3292_v32 = vsel %vm384_vm3, %v5119_v60, %v5100_v48 }
 0x1b6   : > { %3898 = vst [vmem:[%s5132_s19 + $0x10] sm:$0xff] %v4049_v13  ;;  %3899 = vst [vmem:[%s5132_s19 + $0x18] sm:$0xff] %v4050_v16  ;;  %v3238_v21 = vpop.permute.xlu1 %3237 }
 0x1ba   : > { %v3684_v1 = vpop.permute.xlu1 %3683 }
 0x1bb   : > { %v3686_v22 = vsel %vm327_vm2, %v5080_v31, %v3684_v1 }
 0x1bd   : > { %4034 = vmatmul.mubr.msk.bf16.vlgmr.msra.gmra.mrb[12].mxu1 %vm207_vm0, %v4605_v55 }
 0x1be   : > { %4010 = vmatmul.mubr.msk.bf16.vlgmr.msra.gmra.mrb[12].mxu0 %vm207_vm0, %v4605_v55  ;;  %3579 = vmatpush1.bf16.msra.mxu1 %v4930_v27  ;;  %v3186_v55 = vsel %vm270_vm1, %v5063_v14, %v5048_v26  ;;  %v3680_v27 = vpop.permute.xlu1 %3679 }
 0x1bf   : > { %3133 = vmatpush1.bf16.msra.mxu0 %v4829_v37  ;;  %3164 = vmatprep.mubr.bf16.mxu0 %v4353_v0  ;;  %v3240_v37 = vsel %vm327_vm2, %v5066_v34, %v3238_v21  ;;  %v3685_v24 = vsel %vm327_vm2, %v3680_v27, %v5080_v31 }
 0x1c0   : > { %3610 = vmatprep.mubr.bf16.mxu1 %v4353_v0  ;;  %3190 = vmatprep.subr.bf16.mxu0 %v3187_v17 }
 0x1c1   : > { %3636 = vmatprep.subr.bf16.mxu1 %v3633_v18 }
 0x1c2   : > { %v3291_v23 = vpop.permute.xlu1 %3290 }
 0x1c3   : > { %v3293_v26 = vsel %vm384_vm3, %v5100_v48, %v3291_v23 }
 0x1c9   : > { %4037 = vmatmul.mubr.msk.bf16.vlgmr.msra.gmra.mrb[12].mxu1 %vm207_vm0, %v4636_v2 }
 0x1ca   : > { %4013 = vmatmul.mubr.msk.bf16.vlgmr.msra.gmra.mrb[12].mxu0 %vm207_vm0, %v4636_v2  ;;  %3637 = vmatpush1.bf16.msra.mxu1 %v3632_v15  ;;  %v3737_v2 = vpop.permute.xlu1 %3736 }
 0x1cb   : > { %3191 = vmatpush1.bf16.msra.mxu0 %v3186_v55  ;;  %3222 = vmatprep.mubr.bf16.mxu0 %v4353_v0  ;;  %v3739_v28 = vsel %vm384_vm3, %v5113_v54, %v3737_v2 }
 0x1cc   : > { %3668 = vmatprep.mubr.bf16.mxu1 %v4353_v0  ;;  %3243 = vmatprep.subr.bf16.mxu0 %v3240_v37 }
 0x1cd   : > { %3689 = vmatprep.subr.bf16.mxu1 %v3686_v22 }
 0x1ce   : > { %v3733_v29 = vpop.permute.xlu1 %3732 }
 0x1cf   : > { %v3738_v19 = vsel %vm384_vm3, %v3733_v29, %v5113_v54 }
 0x1d5   : > { %4039 = vmatmul.mubr.msk.bf16.vlgmr.msra.gmra.mrb[12].mxu1 %vm207_vm0, %v4662_v20 }
 0x1d6   : > { %4015 = vmatmul.mubr.msk.bf16.vlgmr.msra.gmra.mrb[12].mxu0 %vm207_vm0, %v4662_v20  ;;  %3690 = vmatpush1.bf16.msra.mxu1 %v3685_v24 }
 0x1d7   : > { %3244 = vmatpush1.bf16.msra.mxu0 %v3239_v25  ;;  %3275 = vmatprep.mubr.bf16.mxu0 %v4353_v0 }
 0x1d8   : > { %3721 = vmatprep.mubr.bf16.mxu1 %v4353_v0  ;;  %3296 = vmatprep.subr.bf16.mxu0 %v3293_v26 }
 0x1d9   : > { %3742 = vmatprep.subr.bf16.mxu1 %v3739_v28 }
 0x1e1   : > { %4040 = vmatmul.mubr.msk.bf16.vlgmr.msra.gmra.mrb[12].mxu1 %vm207_vm0, %v4697_v35 }
 0x1e2   : > { %4016 = vmatmul.mubr.msk.bf16.vlgmr.msra.gmra.mrb[12].mxu0 %vm207_vm0, %v4697_v35  ;;  %3743 = vmatpush1.bf16.msra.mxu1 %v3738_v19 }
 0x1e3   : > { %3297 = vmatpush1.bf16.msra.mxu0 %v3292_v32  ;;  %3328 = vmatprep.mubr.bf16.mxu0 %v4353_v0 }
 0x1e4   : > { %3774 = vmatprep.mubr.bf16.mxu1 %v4353_v0 }
 0x1ed   : > { %4041 = vmatmul.mubr.msk.bf16.vlgmr.msra.gmra.mrb[12].mxu1 %vm207_vm0, %v4725_v46 }
 0x1ee   : > { %4017 = vmatmul.mubr.msk.bf16.vlgmr.msra.gmra.mrb[12].mxu0 %vm207_vm0, %v4725_v46 }
 0x208   : > { %v1992_v20 = vpop.f32.mrb[4].mxu1 }
 0x209   : > { %v1546_v14 = vpop.f32.mrb[4].mxu0  ;;  %v4053_v33 = vadd.f32 %v1992_v20, %v5134_v8  ;;  %v1994_v35 = vpop.f32.mrb[5].mxu1 }
 0x20a   : > { %v4051_v34 = vadd.f32 %v1546_v14, %v5134_v8  ;;  %v1548_v36 = vpop.f32.mrb[5].mxu0  ;;  %v4054_v38 = vadd.f32 %v1994_v35, %v5134_v8  ;;  %v1996_v6 = vpop.f32.mrb[6].mxu1 }
 0x20b   : > { %3946 = vst [vmem:[%s5132_s19 + $0x30] sm:$0xff] %v4053_v33  ;;  %v4052_v0 = vadd.f32 %v1548_v36, %v5134_v8  ;;  %v1550_v31 = vpop.f32.mrb[6].mxu0  ;;  %v1997_v39 = vpop.f32.mrb[7].mxu1 }
 0x20c   : > { %3922 = vst [vmem:[%s5132_s19 + $0x20] sm:$0xff] %v4051_v34  ;;  %3947 = vst [vmem:[%s5132_s19 + $0x38] sm:$0xff] %v4054_v38  ;;  %v1551_v46 = vpop.f32.mrb[7].mxu0 }
 0x20d   : > { %3923 = vst [vmem:[%s5132_s19 + $0x28] sm:$0xff] %v4052_v0 }
 0x264   : > { %v2884_v40 = vpop.f32.mrb[8].mxu1 }
 0x265   : > { %v2438_v43 = vpop.f32.mrb[8].mxu0  ;;  %v4057_v42 = vadd.f32 %v2884_v40, %v5134_v8  ;;  %v2886_v44 = vpop.f32.mrb[9].mxu1 }
 0x266   : > { %v4055_v45 = vadd.f32 %v2438_v43, %v5134_v8  ;;  %v2440_v10 = vpop.f32.mrb[9].mxu0  ;;  %v4058_v47 = vadd.f32 %v2886_v44, %v5134_v8  ;;  %v2888_v48 = vpop.f32.mrb[10].mxu1 }
 0x267   : > { %3994 = vst [vmem:[%s5132_s19 + $0x50] sm:$0xff] %v4057_v42  ;;  %v4056_v50 = vadd.f32 %v2440_v10, %v5134_v8  ;;  %v2442_v51 = vpop.f32.mrb[10].mxu0  ;;  %v2889_v52 = vpop.f32.mrb[11].mxu1 }
 0x268   : > { %3970 = vst [vmem:[%s5132_s19 + $0x40] sm:$0xff] %v4055_v45  ;;  %3995 = vst [vmem:[%s5132_s19 + $0x58] sm:$0xff] %v4058_v47  ;;  %v2443_v53 = vpop.f32.mrb[11].mxu0 }
 0x269   : > { %3971 = vst [vmem:[%s5132_s19 + $0x48] sm:$0xff] %v4056_v50 }
 0x2c0   : > { %v3776_v54 = vpop.f32.mrb[12].mxu1 }
 0x2c1   : > { %v3330_v56 = vpop.f32.mrb[12].mxu0  ;;  %v4061_v11 = vadd.f32 %v3776_v54, %v5134_v8  ;;  %v3778_v57 = vpop.f32.mrb[13].mxu1 }
 0x2c2   : > { %v4059_v59 = vadd.f32 %v3330_v56, %v5134_v8  ;;  %v3332_v60 = vpop.f32.mrb[13].mxu0  ;;  %v4062_v30 = vadd.f32 %v3778_v57, %v5134_v8  ;;  %v3780_v49 = vpop.f32.mrb[14].mxu1 }
 0x2c3   : > { %4042 = vst [vmem:[%s5132_s19 + $0x70] sm:$0xff] %v4061_v11  ;;  %v4060_v61 = vadd.f32 %v3332_v60, %v5134_v8  ;;  %v3334_v62 = vpop.f32.mrb[14].mxu0  ;;  %v3781_v63 = vpop.f32.mrb[15].mxu1 }
 0x2c4   : > { %4018 = vst [vmem:[%s5132_s19 + $0x60] sm:$0xff] %v4059_v59  ;;  %4043 = vst [vmem:[%s5132_s19 + $0x78] sm:$0xff] %v4062_v30  ;;  %v3335_v3 = vpop.f32.mrb[15].mxu0 }
 0x2c5   : > { %4019 = vst [vmem:[%s5132_s19 + $0x68] sm:$0xff] %v4060_v61 }
 0x2c6 PF: > { %s13_s12 = sadd.s32 1, %s4351_s12  }
 0x2c7   : > { %p10_p4 = scmp.ge.s32.totalorder %s13_s12, 4  }
 0x2c9   :  { %12 = sbr.rel (!%p10_p4) target bundleno = 1 (0x1), region = 84 }

</bundles_post_ra>
